<compile_context>
chip_gen: v6e
topology: v6e:2x2x1
jax: 0.10.0
libtpu: 0.0.40
codegen_flags: <defaults>
</compile_context>

<pallas_src>
import functools

import jax
import jax.numpy as jnp
import numpy as np
from jax import lax
from jax.experimental import pallas as pl
from jax.experimental.pallas import tpu as pltpu

LANES = 128  # max supported y-sequence length in this kernel


def _dtw_kernel(x_ref, yt_ref, o_ref, dist_ref, s_ref, *, m):
    x = x_ref[...]            # (N, D)     f32
    yt = yt_ref[...]          # (D, LANES) f32, columns >= m are zero
    n = x.shape[0]
    lp = yt.shape[1]

    BIG = jnp.float32(1e30)
    lane1 = lax.broadcasted_iota(jnp.int32, (1, lp), 1)        # (1, LANES)

    # Hoisted constants: scan shifts (ceil(log2(m)) of them), per-shift lane
    # masks, column-0 mask, and the pad mask.  Computed once, reused across
    # the fully unrolled DP loop.
    nsteps = (m - 1).bit_length()                              # 0 if m == 1
    shifts = [1 << k for k in range(nsteps)]
    shift_masks = [lane1 < s for s in shifts]                  # wrapped lanes
    col0_mask = lane1 == 0
    pad_mask = lane1 < m

    # ---- pairwise Euclidean distance matrix d[i,j] = ||x_i - y_j|| (MXU) ----
    xy = jnp.dot(x, yt, preferred_element_type=jnp.float32,
                 precision=lax.Precision.HIGHEST)              # (N, LANES)
    xx = jnp.sum(x * x, axis=1, keepdims=True)                 # (N, 1)
    yy = jnp.sum(yt * yt, axis=0, keepdims=True)               # (1, LANES)
    dist = jnp.sqrt(jnp.maximum(xx + yy - 2.0 * xy, 0.0))      # (N, LANES)
    dist = jnp.where(pad_mask, dist, 0.0)                      # zero pad lanes
    dist_ref[...] = dist

    # ---- per-row lane prefix sums: roll+add Hillis-Steele scan (XLU+VPU), ---
    # ---- all N rows at once, ceil(log2(m)) steps, no triu matmul.        ----
    s = dist
    for sh, msk in zip(shifts, shift_masks):
        shifted = pltpu.roll(s, shift=sh, axis=1)
        s = s + jnp.where(msk, 0.0, shifted)
    s_ref[...] = s

    def cummin(v):
        # Inclusive cumulative-min over lanes 0..m-1: ceil(log2(m)) roll+min
        # steps on a single (1, 128) vreg (XLU roll co-issues with VPU min).
        for sh, msk in zip(shifts, shift_masks):
            shifted = pltpu.roll(v, shift=sh, axis=1)
            v = jnp.minimum(v, jnp.where(msk, BIG, shifted))
        return v

    # symmetric2 recursion, one DTW row per iteration:
    #   g[i,j] = min(g[i-1,j-1] + 2 d, g[i-1,j] + d, g[i,j-1] + d)
    # Within-row dependency solved in closed form with a min-plus prefix scan:
    #   c[j] = min(g_prev[j-1] + 2 d[j], g_prev[j] + d[j])
    #   g[j] = S[j] + cummin(c - S)[j],   S[j] = sum_{k<=j} d[k]
    g = s_ref[0:1, :]         # DTW row 0: only horizontal moves -> cumsum
    for i in range(1, n):     # n is static: immediate row offsets
        d_row = dist_ref[i:i + 1, :]                           # (1, LANES)
        s_row = s_ref[i:i + 1, :]                              # (1, LANES)
        gp_sh = jnp.where(col0_mask, BIG, pltpu.roll(g, shift=1, axis=1))
        c = jnp.minimum(gp_sh + 2.0 * d_row, g + d_row)
        g = s_row + cummin(c - s_row)

    # Lane-dense (1, 128) output; wrapper slices g[0, m-1].
    o_ref[...] = g


@jax.jit
def dtw_distance(x, y):
    """Unnormalized DTW distance (Euclidean cost, symmetric2 steps)."""
    n, d = x.shape
    m, d2 = y.shape
    assert d == d2 and m <= LANES
    yt = jnp.zeros((d, LANES), jnp.float32).at[:, :m].set(y.T.astype(jnp.float32))

    out = pl.pallas_call(
        functools.partial(_dtw_kernel, m=m),
        out_shape=jax.ShapeDtypeStruct((1, LANES), jnp.float32),
        in_specs=[
            pl.BlockSpec(memory_space=pltpu.MemorySpace.VMEM),
            pl.BlockSpec(memory_space=pltpu.MemorySpace.VMEM),
        ],
        out_specs=pl.BlockSpec(memory_space=pltpu.MemorySpace.VMEM),
        scratch_shapes=[
            pltpu.VMEM((n, LANES), jnp.float32),   # dist matrix
            pltpu.VMEM((n, LANES), jnp.float32),   # per-row lane prefix sums
        ],
    )(x.astype(jnp.float32), yt)
    # Torch module returns a 0-d float32 tensor (graph is detached; value only).
    return out[0, m - 1]


def _dtw_reference(x, y):
    """Plain numpy reimplementation of dtw-python's default (symmetric2)."""
    x = np.asarray(x, np.float64)
    y = np.asarray(y, np.float64)
    n, m = x.shape[0], y.shape[0]
    d = np.sqrt(((x[:, None, :] - y[None, :, :]) ** 2).sum(-1))
    g = np.zeros((n, m))
    g[0, 0] = d[0, 0]
    for j in range(1, m):
        g[0, j] = g[0, j - 1] + d[0, j]
    for i in range(1, n):
        g[i, 0] = g[i - 1, 0] + d[i, 0]
        for j in range(1, m):
            g[i, j] = min(g[i - 1, j - 1] + 2.0 * d[i, j],
                          g[i - 1, j] + d[i, j],
                          g[i, j - 1] + d[i, j])
    return np.float32(g[-1, -1])


if __name__ == "__main__":
    key = jax.random.PRNGKey(0)
    kx, ky = jax.random.split(key)
    # Two multivariate time series: x has 16 steps, y has 12 steps, 32 features.
    x = jax.random.normal(kx, (16, 32), dtype=jnp.float32)
    y = jax.random.normal(ky, (12, 32), dtype=jnp.float32)

    out = dtw_distance(x, y)
    out = jax.block_until_ready(out)

    ref = _dtw_reference(np.asarray(x), np.asarray(y))
    assert out.dtype == jnp.float32
    assert np.allclose(np.asarray(out), ref, rtol=2e-3, atol=1e-2), (out, ref)
    print("KERNEL_OK")
</pallas_src>

<mosaic_0001>
module attributes {stable_mosaic.version = 11 : i64} {
  func.func @_dtw_kernel(%arg0: memref<16x32xf32, #tpu.memory_space<vmem>>, %arg1: memref<32x128xf32, #tpu.memory_space<vmem>>, %arg2: memref<1x128xf32, #tpu.memory_space<vmem>>, %arg3: memref<16x128xf32, #tpu.memory_space<vmem>>, %arg4: memref<16x128xf32, #tpu.memory_space<vmem>>) attributes {dimension_semantics = [], scalar_prefetch = 0 : i64, scratch_operands = 2 : i64, tpu.core_type = #tpu.core_type<tc>} {
    %c0 = arith.constant 0 : index
    %c0_0 = arith.constant 0 : index
    %0 = vector.load %arg0[%c0, %c0_0] : memref<16x32xf32, #tpu.memory_space<vmem>>, vector<16x32xf32>
    %c0_1 = arith.constant 0 : index
    %c0_2 = arith.constant 0 : index
    %1 = vector.load %arg1[%c0_1, %c0_2] : memref<32x128xf32, #tpu.memory_space<vmem>>, vector<32x128xf32>
    %2 = tpu.iota {dimensions = array<i32: 1>} : vector<1x128xi32>
    %c1_i32 = arith.constant 1 : i32
    %3 = vector.broadcast %c1_i32 : i32 to vector<1x128xi32>
    %4 = arith.cmpi slt, %2, %3 : vector<1x128xi32>
    %c2_i32 = arith.constant 2 : i32
    %5 = vector.broadcast %c2_i32 : i32 to vector<1x128xi32>
    %6 = arith.cmpi slt, %2, %5 : vector<1x128xi32>
    %c4_i32 = arith.constant 4 : i32
    %7 = vector.broadcast %c4_i32 : i32 to vector<1x128xi32>
    %8 = arith.cmpi slt, %2, %7 : vector<1x128xi32>
    %c8_i32 = arith.constant 8 : i32
    %9 = vector.broadcast %c8_i32 : i32 to vector<1x128xi32>
    %10 = arith.cmpi slt, %2, %9 : vector<1x128xi32>
    %c0_i32 = arith.constant 0 : i32
    %11 = vector.broadcast %c0_i32 : i32 to vector<1x128xi32>
    %12 = arith.cmpi eq, %2, %11 : vector<1x128xi32>
    %c12_i32 = arith.constant 12 : i32
    %13 = vector.broadcast %c12_i32 : i32 to vector<1x128xi32>
    %14 = arith.cmpi slt, %2, %13 : vector<1x128xi32>
    %cst = arith.constant dense<0.000000e+00> : vector<16x128xf32>
    %15 = tpu.matmul %0, %1, %cst {dimension_numbers = #tpu.dot_dimension_numbers<[1], [0], [0], [1], [0, 0, 1, 1], [], []>, precision = #tpu.contract_precision<fp32>} : vector<16x32xf32>, vector<32x128xf32>, vector<16x128xf32> -> vector<16x128xf32>
    %16 = arith.mulf %0, %0 : vector<16x32xf32>
    %cst_3 = arith.constant dense<0.000000e+00> : vector<16xf32>
    %17 = vector.multi_reduction <add>, %16, %cst_3 [1] : vector<16x32xf32> to vector<16xf32>
    %18 = vector.shape_cast %17 : vector<16xf32> to vector<16x1xf32>
    %19 = arith.mulf %1, %1 : vector<32x128xf32>
    %cst_4 = arith.constant dense<0.000000e+00> : vector<128xf32>
    %20 = vector.multi_reduction <add>, %19, %cst_4 [0] : vector<32x128xf32> to vector<128xf32>
    %21 = vector.shape_cast %20 : vector<128xf32> to vector<1x128xf32>
    %22 = vector.broadcast %18 : vector<16x1xf32> to vector<16x128xf32>
    %23 = vector.broadcast %21 : vector<1x128xf32> to vector<16x128xf32>
    %24 = arith.addf %22, %23 : vector<16x128xf32>
    %cst_5 = arith.constant 2.000000e+00 : f32
    %25 = vector.broadcast %cst_5 : f32 to vector<16x128xf32>
    %26 = arith.mulf %25, %15 : vector<16x128xf32>
    %27 = arith.subf %24, %26 : vector<16x128xf32>
    %cst_6 = arith.constant 0.000000e+00 : f32
    %28 = vector.broadcast %cst_6 : f32 to vector<16x128xf32>
    %29 = arith.maximumf %27, %28 : vector<16x128xf32>
    %30 = math.sqrt %29 : vector<16x128xf32>
    %cst_7 = arith.constant 0.000000e+00 : f32
    %31 = vector.shape_cast %14 : vector<1x128xi1> to vector<1x128xi1>
    %32 = vector.broadcast %31 : vector<1x128xi1> to vector<16x128xi1>
    %33 = vector.broadcast %cst_7 : f32 to vector<16x128xf32>
    %34 = arith.select %32, %30, %33 : vector<16x128xi1>, vector<16x128xf32>
    %c0_8 = arith.constant 0 : index
    %c0_9 = arith.constant 0 : index
    %35 = vector.load %arg3[%c0_8, %c0_9] : memref<16x128xf32, #tpu.memory_space<vmem>>, vector<16x128xf32>
    tpu.vector_store %arg3[%c0_8, %c0_9], %34 {strides = array<i32>} : memref<16x128xf32, #tpu.memory_space<vmem>>, vector<16x128xf32>,
    %c1_i32_10 = arith.constant 1 : i32
    %36 = tpu.dynamic_rotate %34 by %c1_i32_10 dim 1 : vector<16x128xf32>, i32 -> vector<16x128xf32>
    %cst_11 = arith.constant 0.000000e+00 : f32
    %37 = vector.shape_cast %4 : vector<1x128xi1> to vector<1x128xi1>
    %38 = vector.broadcast %37 : vector<1x128xi1> to vector<16x128xi1>
    %39 = vector.broadcast %cst_11 : f32 to vector<16x128xf32>
    %40 = arith.select %38, %39, %36 : vector<16x128xi1>, vector<16x128xf32>
    %41 = arith.addf %34, %40 : vector<16x128xf32>
    %c2_i32_12 = arith.constant 2 : i32
    %42 = tpu.dynamic_rotate %41 by %c2_i32_12 dim 1 : vector<16x128xf32>, i32 -> vector<16x128xf32>
    %cst_13 = arith.constant 0.000000e+00 : f32
    %43 = vector.shape_cast %6 : vector<1x128xi1> to vector<1x128xi1>
    %44 = vector.broadcast %43 : vector<1x128xi1> to vector<16x128xi1>
    %45 = vector.broadcast %cst_13 : f32 to vector<16x128xf32>
    %46 = arith.select %44, %45, %42 : vector<16x128xi1>, vector<16x128xf32>
    %47 = arith.addf %41, %46 : vector<16x128xf32>
    %c4_i32_14 = arith.constant 4 : i32
    %48 = tpu.dynamic_rotate %47 by %c4_i32_14 dim 1 : vector<16x128xf32>, i32 -> vector<16x128xf32>
    %cst_15 = arith.constant 0.000000e+00 : f32
    %49 = vector.shape_cast %8 : vector<1x128xi1> to vector<1x128xi1>
    %50 = vector.broadcast %49 : vector<1x128xi1> to vector<16x128xi1>
    %51 = vector.broadcast %cst_15 : f32 to vector<16x128xf32>
    %52 = arith.select %50, %51, %48 : vector<16x128xi1>, vector<16x128xf32>
    %53 = arith.addf %47, %52 : vector<16x128xf32>
    %c8_i32_16 = arith.constant 8 : i32
    %54 = tpu.dynamic_rotate %53 by %c8_i32_16 dim 1 : vector<16x128xf32>, i32 -> vector<16x128xf32>
    %cst_17 = arith.constant 0.000000e+00 : f32
    %55 = vector.shape_cast %10 : vector<1x128xi1> to vector<1x128xi1>
    %56 = vector.broadcast %55 : vector<1x128xi1> to vector<16x128xi1>
    %57 = vector.broadcast %cst_17 : f32 to vector<16x128xf32>
    %58 = arith.select %56, %57, %54 : vector<16x128xi1>, vector<16x128xf32>
    %59 = arith.addf %53, %58 : vector<16x128xf32>
    %c0_18 = arith.constant 0 : index
    %c0_19 = arith.constant 0 : index
    %60 = vector.load %arg4[%c0_18, %c0_19] : memref<16x128xf32, #tpu.memory_space<vmem>>, vector<16x128xf32>
    tpu.vector_store %arg4[%c0_18, %c0_19], %59 {strides = array<i32>} : memref<16x128xf32, #tpu.memory_space<vmem>>, vector<16x128xf32>,
    %c0_20 = arith.constant 0 : index
    %c0_21 = arith.constant 0 : index
    %61 = vector.load %arg4[%c0_20, %c0_21] : memref<16x128xf32, #tpu.memory_space<vmem>>, vector<1x128xf32>
    %c1 = arith.constant 1 : index
    %c0_22 = arith.constant 0 : index
    %62 = vector.load %arg3[%c1, %c0_22] : memref<16x128xf32, #tpu.memory_space<vmem>>, vector<1x128xf32>
    %c1_23 = arith.constant 1 : index
    %c0_24 = arith.constant 0 : index
    %63 = vector.load %arg4[%c1_23, %c0_24] : memref<16x128xf32, #tpu.memory_space<vmem>>, vector<1x128xf32>
    %c1_i32_25 = arith.constant 1 : i32
    %64 = tpu.dynamic_rotate %61 by %c1_i32_25 dim 1 : vector<1x128xf32>, i32 -> vector<1x128xf32>
    %cst_26 = arith.constant 1.000000e+30 : f32
    %65 = vector.broadcast %cst_26 : f32 to vector<1x128xf32>
    %66 = arith.select %12, %65, %64 : vector<1x128xi1>, vector<1x128xf32>
    %cst_27 = arith.constant 2.000000e+00 : f32
    %67 = vector.broadcast %cst_27 : f32 to vector<1x128xf32>
    %68 = arith.mulf %67, %62 : vector<1x128xf32>
    %69 = arith.addf %66, %68 : vector<1x128xf32>
    %70 = arith.addf %61, %62 : vector<1x128xf32>
    %71 = arith.minimumf %69, %70 : vector<1x128xf32>
    %72 = arith.subf %71, %63 : vector<1x128xf32>
    %c1_i32_28 = arith.constant 1 : i32
    %73 = tpu.dynamic_rotate %72 by %c1_i32_28 dim 1 : vector<1x128xf32>, i32 -> vector<1x128xf32>
    %cst_29 = arith.constant 1.000000e+30 : f32
    %74 = vector.broadcast %cst_29 : f32 to vector<1x128xf32>
    %75 = arith.select %4, %74, %73 : vector<1x128xi1>, vector<1x128xf32>
    %76 = arith.minimumf %72, %75 : vector<1x128xf32>
    %c2_i32_30 = arith.constant 2 : i32
    %77 = tpu.dynamic_rotate %76 by %c2_i32_30 dim 1 : vector<1x128xf32>, i32 -> vector<1x128xf32>
    %cst_31 = arith.constant 1.000000e+30 : f32
    %78 = vector.broadcast %cst_31 : f32 to vector<1x128xf32>
    %79 = arith.select %6, %78, %77 : vector<1x128xi1>, vector<1x128xf32>
    %80 = arith.minimumf %76, %79 : vector<1x128xf32>
    %c4_i32_32 = arith.constant 4 : i32
    %81 = tpu.dynamic_rotate %80 by %c4_i32_32 dim 1 : vector<1x128xf32>, i32 -> vector<1x128xf32>
    %cst_33 = arith.constant 1.000000e+30 : f32
    %82 = vector.broadcast %cst_33 : f32 to vector<1x128xf32>
    %83 = arith.select %8, %82, %81 : vector<1x128xi1>, vector<1x128xf32>
    %84 = arith.minimumf %80, %83 : vector<1x128xf32>
    %c8_i32_34 = arith.constant 8 : i32
    %85 = tpu.dynamic_rotate %84 by %c8_i32_34 dim 1 : vector<1x128xf32>, i32 -> vector<1x128xf32>
    %cst_35 = arith.constant 1.000000e+30 : f32
    %86 = vector.broadcast %cst_35 : f32 to vector<1x128xf32>
    %87 = arith.select %10, %86, %85 : vector<1x128xi1>, vector<1x128xf32>
    %88 = arith.minimumf %84, %87 : vector<1x128xf32>
    %89 = arith.addf %63, %88 : vector<1x128xf32>
    %c2 = arith.constant 2 : index
    %c0_36 = arith.constant 0 : index
    %90 = vector.load %arg3[%c2, %c0_36] : memref<16x128xf32, #tpu.memory_space<vmem>>, vector<1x128xf32>
    %c2_37 = arith.constant 2 : index
    %c0_38 = arith.constant 0 : index
    %91 = vector.load %arg4[%c2_37, %c0_38] : memref<16x128xf32, #tpu.memory_space<vmem>>, vector<1x128xf32>
    %c1_i32_39 = arith.constant 1 : i32
    %92 = tpu.dynamic_rotate %89 by %c1_i32_39 dim 1 : vector<1x128xf32>, i32 -> vector<1x128xf32>
    %cst_40 = arith.constant 1.000000e+30 : f32
    %93 = vector.broadcast %cst_40 : f32 to vector<1x128xf32>
    %94 = arith.select %12, %93, %92 : vector<1x128xi1>, vector<1x128xf32>
    %cst_41 = arith.constant 2.000000e+00 : f32
    %95 = vector.broadcast %cst_41 : f32 to vector<1x128xf32>
    %96 = arith.mulf %95, %90 : vector<1x128xf32>
    %97 = arith.addf %94, %96 : vector<1x128xf32>
    %98 = arith.addf %89, %90 : vector<1x128xf32>
    %99 = arith.minimumf %97, %98 : vector<1x128xf32>
    %100 = arith.subf %99, %91 : vector<1x128xf32>
    %c1_i32_42 = arith.constant 1 : i32
    %101 = tpu.dynamic_rotate %100 by %c1_i32_42 dim 1 : vector<1x128xf32>, i32 -> vector<1x128xf32>
    %cst_43 = arith.constant 1.000000e+30 : f32
    %102 = vector.broadcast %cst_43 : f32 to vector<1x128xf32>
    %103 = arith.select %4, %102, %101 : vector<1x128xi1>, vector<1x128xf32>
    %104 = arith.minimumf %100, %103 : vector<1x128xf32>
    %c2_i32_44 = arith.constant 2 : i32
    %105 = tpu.dynamic_rotate %104 by %c2_i32_44 dim 1 : vector<1x128xf32>, i32 -> vector<1x128xf32>
    %cst_45 = arith.constant 1.000000e+30 : f32
    %106 = vector.broadcast %cst_45 : f32 to vector<1x128xf32>
    %107 = arith.select %6, %106, %105 : vector<1x128xi1>, vector<1x128xf32>
    %108 = arith.minimumf %104, %107 : vector<1x128xf32>
    %c4_i32_46 = arith.constant 4 : i32
    %109 = tpu.dynamic_rotate %108 by %c4_i32_46 dim 1 : vector<1x128xf32>, i32 -> vector<1x128xf32>
    %cst_47 = arith.constant 1.000000e+30 : f32
    %110 = vector.broadcast %cst_47 : f32 to vector<1x128xf32>
    %111 = arith.select %8, %110, %109 : vector<1x128xi1>, vector<1x128xf32>
    %112 = arith.minimumf %108, %111 : vector<1x128xf32>
    %c8_i32_48 = arith.constant 8 : i32
    %113 = tpu.dynamic_rotate %112 by %c8_i32_48 dim 1 : vector<1x128xf32>, i32 -> vector<1x128xf32>
    %cst_49 = arith.constant 1.000000e+30 : f32
    %114 = vector.broadcast %cst_49 : f32 to vector<1x128xf32>
    %115 = arith.select %10, %114, %113 : vector<1x128xi1>, vector<1x128xf32>
    %116 = arith.minimumf %112, %115 : vector<1x128xf32>
    %117 = arith.addf %91, %116 : vector<1x128xf32>
    %c3 = arith.constant 3 : index
    %c0_50 = arith.constant 0 : index
    %118 = vector.load %arg3[%c3, %c0_50] : memref<16x128xf32, #tpu.memory_space<vmem>>, vector<1x128xf32>
    %c3_51 = arith.constant 3 : index
    %c0_52 = arith.constant 0 : index
    %119 = vector.load %arg4[%c3_51, %c0_52] : memref<16x128xf32, #tpu.memory_space<vmem>>, vector<1x128xf32>
    %c1_i32_53 = arith.constant 1 : i32
    %120 = tpu.dynamic_rotate %117 by %c1_i32_53 dim 1 : vector<1x128xf32>, i32 -> vector<1x128xf32>
    %cst_54 = arith.constant 1.000000e+30 : f32
    %121 = vector.broadcast %cst_54 : f32 to vector<1x128xf32>
    %122 = arith.select %12, %121, %120 : vector<1x128xi1>, vector<1x128xf32>
    %cst_55 = arith.constant 2.000000e+00 : f32
    %123 = vector.broadcast %cst_55 : f32 to vector<1x128xf32>
    %124 = arith.mulf %123, %118 : vector<1x128xf32>
    %125 = arith.addf %122, %124 : vector<1x128xf32>
    %126 = arith.addf %117, %118 : vector<1x128xf32>
    %127 = arith.minimumf %125, %126 : vector<1x128xf32>
    %128 = arith.subf %127, %119 : vector<1x128xf32>
    %c1_i32_56 = arith.constant 1 : i32
    %129 = tpu.dynamic_rotate %128 by %c1_i32_56 dim 1 : vector<1x128xf32>, i32 -> vector<1x128xf32>
    %cst_57 = arith.constant 1.000000e+30 : f32
    %130 = vector.broadcast %cst_57 : f32 to vector<1x128xf32>
    %131 = arith.select %4, %130, %129 : vector<1x128xi1>, vector<1x128xf32>
    %132 = arith.minimumf %128, %131 : vector<1x128xf32>
    %c2_i32_58 = arith.constant 2 : i32
    %133 = tpu.dynamic_rotate %132 by %c2_i32_58 dim 1 : vector<1x128xf32>, i32 -> vector<1x128xf32>
    %cst_59 = arith.constant 1.000000e+30 : f32
    %134 = vector.broadcast %cst_59 : f32 to vector<1x128xf32>
    %135 = arith.select %6, %134, %133 : vector<1x128xi1>, vector<1x128xf32>
    %136 = arith.minimumf %132, %135 : vector<1x128xf32>
    %c4_i32_60 = arith.constant 4 : i32
    %137 = tpu.dynamic_rotate %136 by %c4_i32_60 dim 1 : vector<1x128xf32>, i32 -> vector<1x128xf32>
    %cst_61 = arith.constant 1.000000e+30 : f32
    %138 = vector.broadcast %cst_61 : f32 to vector<1x128xf32>
    %139 = arith.select %8, %138, %137 : vector<1x128xi1>, vector<1x128xf32>
    %140 = arith.minimumf %136, %139 : vector<1x128xf32>
    %c8_i32_62 = arith.constant 8 : i32
    %141 = tpu.dynamic_rotate %140 by %c8_i32_62 dim 1 : vector<1x128xf32>, i32 -> vector<1x128xf32>
    %cst_63 = arith.constant 1.000000e+30 : f32
    %142 = vector.broadcast %cst_63 : f32 to vector<1x128xf32>
    %143 = arith.select %10, %142, %141 : vector<1x128xi1>, vector<1x128xf32>
    %144 = arith.minimumf %140, %143 : vector<1x128xf32>
    %145 = arith.addf %119, %144 : vector<1x128xf32>
    %c4 = arith.constant 4 : index
    %c0_64 = arith.constant 0 : index
    %146 = vector.load %arg3[%c4, %c0_64] : memref<16x128xf32, #tpu.memory_space<vmem>>, vector<1x128xf32>
    %c4_65 = arith.constant 4 : index
    %c0_66 = arith.constant 0 : index
    %147 = vector.load %arg4[%c4_65, %c0_66] : memref<16x128xf32, #tpu.memory_space<vmem>>, vector<1x128xf32>
    %c1_i32_67 = arith.constant 1 : i32
    %148 = tpu.dynamic_rotate %145 by %c1_i32_67 dim 1 : vector<1x128xf32>, i32 -> vector<1x128xf32>
    %cst_68 = arith.constant 1.000000e+30 : f32
    %149 = vector.broadcast %cst_68 : f32 to vector<1x128xf32>
    %150 = arith.select %12, %149, %148 : vector<1x128xi1>, vector<1x128xf32>
    %cst_69 = arith.constant 2.000000e+00 : f32
    %151 = vector.broadcast %cst_69 : f32 to vector<1x128xf32>
    %152 = arith.mulf %151, %146 : vector<1x128xf32>
    %153 = arith.addf %150, %152 : vector<1x128xf32>
    %154 = arith.addf %145, %146 : vector<1x128xf32>
    %155 = arith.minimumf %153, %154 : vector<1x128xf32>
    %156 = arith.subf %155, %147 : vector<1x128xf32>
    %c1_i32_70 = arith.constant 1 : i32
    %157 = tpu.dynamic_rotate %156 by %c1_i32_70 dim 1 : vector<1x128xf32>, i32 -> vector<1x128xf32>
    %cst_71 = arith.constant 1.000000e+30 : f32
    %158 = vector.broadcast %cst_71 : f32 to vector<1x128xf32>
    %159 = arith.select %4, %158, %157 : vector<1x128xi1>, vector<1x128xf32>
    %160 = arith.minimumf %156, %159 : vector<1x128xf32>
    %c2_i32_72 = arith.constant 2 : i32
    %161 = tpu.dynamic_rotate %160 by %c2_i32_72 dim 1 : vector<1x128xf32>, i32 -> vector<1x128xf32>
    %cst_73 = arith.constant 1.000000e+30 : f32
    %162 = vector.broadcast %cst_73 : f32 to vector<1x128xf32>
    %163 = arith.select %6, %162, %161 : vector<1x128xi1>, vector<1x128xf32>
    %164 = arith.minimumf %160, %163 : vector<1x128xf32>
    %c4_i32_74 = arith.constant 4 : i32
    %165 = tpu.dynamic_rotate %164 by %c4_i32_74 dim 1 : vector<1x128xf32>, i32 -> vector<1x128xf32>
    %cst_75 = arith.constant 1.000000e+30 : f32
    %166 = vector.broadcast %cst_75 : f32 to vector<1x128xf32>
    %167 = arith.select %8, %166, %165 : vector<1x128xi1>, vector<1x128xf32>
    %168 = arith.minimumf %164, %167 : vector<1x128xf32>
    %c8_i32_76 = arith.constant 8 : i32
    %169 = tpu.dynamic_rotate %168 by %c8_i32_76 dim 1 : vector<1x128xf32>, i32 -> vector<1x128xf32>
    %cst_77 = arith.constant 1.000000e+30 : f32
    %170 = vector.broadcast %cst_77 : f32 to vector<1x128xf32>
    %171 = arith.select %10, %170, %169 : vector<1x128xi1>, vector<1x128xf32>
    %172 = arith.minimumf %168, %171 : vector<1x128xf32>
    %173 = arith.addf %147, %172 : vector<1x128xf32>
    %c5 = arith.constant 5 : index
    %c0_78 = arith.constant 0 : index
    %174 = vector.load %arg3[%c5, %c0_78] : memref<16x128xf32, #tpu.memory_space<vmem>>, vector<1x128xf32>
    %c5_79 = arith.constant 5 : index
    %c0_80 = arith.constant 0 : index
    %175 = vector.load %arg4[%c5_79, %c0_80] : memref<16x128xf32, #tpu.memory_space<vmem>>, vector<1x128xf32>
    %c1_i32_81 = arith.constant 1 : i32
    %176 = tpu.dynamic_rotate %173 by %c1_i32_81 dim 1 : vector<1x128xf32>, i32 -> vector<1x128xf32>
    %cst_82 = arith.constant 1.000000e+30 : f32
    %177 = vector.broadcast %cst_82 : f32 to vector<1x128xf32>
    %178 = arith.select %12, %177, %176 : vector<1x128xi1>, vector<1x128xf32>
    %cst_83 = arith.constant 2.000000e+00 : f32
    %179 = vector.broadcast %cst_83 : f32 to vector<1x128xf32>
    %180 = arith.mulf %179, %174 : vector<1x128xf32>
    %181 = arith.addf %178, %180 : vector<1x128xf32>
    %182 = arith.addf %173, %174 : vector<1x128xf32>
    %183 = arith.minimumf %181, %182 : vector<1x128xf32>
    %184 = arith.subf %183, %175 : vector<1x128xf32>
    %c1_i32_84 = arith.constant 1 : i32
    %185 = tpu.dynamic_rotate %184 by %c1_i32_84 dim 1 : vector<1x128xf32>, i32 -> vector<1x128xf32>
    %cst_85 = arith.constant 1.000000e+30 : f32
    %186 = vector.broadcast %cst_85 : f32 to vector<1x128xf32>
    %187 = arith.select %4, %186, %185 : vector<1x128xi1>, vector<1x128xf32>
    %188 = arith.minimumf %184, %187 : vector<1x128xf32>
    %c2_i32_86 = arith.constant 2 : i32
    %189 = tpu.dynamic_rotate %188 by %c2_i32_86 dim 1 : vector<1x128xf32>, i32 -> vector<1x128xf32>
    %cst_87 = arith.constant 1.000000e+30 : f32
    %190 = vector.broadcast %cst_87 : f32 to vector<1x128xf32>
    %191 = arith.select %6, %190, %189 : vector<1x128xi1>, vector<1x128xf32>
    %192 = arith.minimumf %188, %191 : vector<1x128xf32>
    %c4_i32_88 = arith.constant 4 : i32
    %193 = tpu.dynamic_rotate %192 by %c4_i32_88 dim 1 : vector<1x128xf32>, i32 -> vector<1x128xf32>
    %cst_89 = arith.constant 1.000000e+30 : f32
    %194 = vector.broadcast %cst_89 : f32 to vector<1x128xf32>
    %195 = arith.select %8, %194, %193 : vector<1x128xi1>, vector<1x128xf32>
    %196 = arith.minimumf %192, %195 : vector<1x128xf32>
    %c8_i32_90 = arith.constant 8 : i32
    %197 = tpu.dynamic_rotate %196 by %c8_i32_90 dim 1 : vector<1x128xf32>, i32 -> vector<1x128xf32>
    %cst_91 = arith.constant 1.000000e+30 : f32
    %198 = vector.broadcast %cst_91 : f32 to vector<1x128xf32>
    %199 = arith.select %10, %198, %197 : vector<1x128xi1>, vector<1x128xf32>
    %200 = arith.minimumf %196, %199 : vector<1x128xf32>
    %201 = arith.addf %175, %200 : vector<1x128xf32>
    %c6 = arith.constant 6 : index
    %c0_92 = arith.constant 0 : index
    %202 = vector.load %arg3[%c6, %c0_92] : memref<16x128xf32, #tpu.memory_space<vmem>>, vector<1x128xf32>
    %c6_93 = arith.constant 6 : index
    %c0_94 = arith.constant 0 : index
    %203 = vector.load %arg4[%c6_93, %c0_94] : memref<16x128xf32, #tpu.memory_space<vmem>>, vector<1x128xf32>
    %c1_i32_95 = arith.constant 1 : i32
    %204 = tpu.dynamic_rotate %201 by %c1_i32_95 dim 1 : vector<1x128xf32>, i32 -> vector<1x128xf32>
    %cst_96 = arith.constant 1.000000e+30 : f32
    %205 = vector.broadcast %cst_96 : f32 to vector<1x128xf32>
    %206 = arith.select %12, %205, %204 : vector<1x128xi1>, vector<1x128xf32>
    %cst_97 = arith.constant 2.000000e+00 : f32
    %207 = vector.broadcast %cst_97 : f32 to vector<1x128xf32>
    %208 = arith.mulf %207, %202 : vector<1x128xf32>
    %209 = arith.addf %206, %208 : vector<1x128xf32>
    %210 = arith.addf %201, %202 : vector<1x128xf32>
    %211 = arith.minimumf %209, %210 : vector<1x128xf32>
    %212 = arith.subf %211, %203 : vector<1x128xf32>
    %c1_i32_98 = arith.constant 1 : i32
    %213 = tpu.dynamic_rotate %212 by %c1_i32_98 dim 1 : vector<1x128xf32>, i32 -> vector<1x128xf32>
    %cst_99 = arith.constant 1.000000e+30 : f32
    %214 = vector.broadcast %cst_99 : f32 to vector<1x128xf32>
    %215 = arith.select %4, %214, %213 : vector<1x128xi1>, vector<1x128xf32>
    %216 = arith.minimumf %212, %215 : vector<1x128xf32>
    %c2_i32_100 = arith.constant 2 : i32
    %217 = tpu.dynamic_rotate %216 by %c2_i32_100 dim 1 : vector<1x128xf32>, i32 -> vector<1x128xf32>
    %cst_101 = arith.constant 1.000000e+30 : f32
    %218 = vector.broadcast %cst_101 : f32 to vector<1x128xf32>
    %219 = arith.select %6, %218, %217 : vector<1x128xi1>, vector<1x128xf32>
    %220 = arith.minimumf %216, %219 : vector<1x128xf32>
    %c4_i32_102 = arith.constant 4 : i32
    %221 = tpu.dynamic_rotate %220 by %c4_i32_102 dim 1 : vector<1x128xf32>, i32 -> vector<1x128xf32>
    %cst_103 = arith.constant 1.000000e+30 : f32
    %222 = vector.broadcast %cst_103 : f32 to vector<1x128xf32>
    %223 = arith.select %8, %222, %221 : vector<1x128xi1>, vector<1x128xf32>
    %224 = arith.minimumf %220, %223 : vector<1x128xf32>
    %c8_i32_104 = arith.constant 8 : i32
    %225 = tpu.dynamic_rotate %224 by %c8_i32_104 dim 1 : vector<1x128xf32>, i32 -> vector<1x128xf32>
    %cst_105 = arith.constant 1.000000e+30 : f32
    %226 = vector.broadcast %cst_105 : f32 to vector<1x128xf32>
    %227 = arith.select %10, %226, %225 : vector<1x128xi1>, vector<1x128xf32>
    %228 = arith.minimumf %224, %227 : vector<1x128xf32>
    %229 = arith.addf %203, %228 : vector<1x128xf32>
    %c7 = arith.constant 7 : index
    %c0_106 = arith.constant 0 : index
    %230 = vector.load %arg3[%c7, %c0_106] : memref<16x128xf32, #tpu.memory_space<vmem>>, vector<1x128xf32>
    %c7_107 = arith.constant 7 : index
    %c0_108 = arith.constant 0 : index
    %231 = vector.load %arg4[%c7_107, %c0_108] : memref<16x128xf32, #tpu.memory_space<vmem>>, vector<1x128xf32>
    %c1_i32_109 = arith.constant 1 : i32
    %232 = tpu.dynamic_rotate %229 by %c1_i32_109 dim 1 : vector<1x128xf32>, i32 -> vector<1x128xf32>
    %cst_110 = arith.constant 1.000000e+30 : f32
    %233 = vector.broadcast %cst_110 : f32 to vector<1x128xf32>
    %234 = arith.select %12, %233, %232 : vector<1x128xi1>, vector<1x128xf32>
    %cst_111 = arith.constant 2.000000e+00 : f32
    %235 = vector.broadcast %cst_111 : f32 to vector<1x128xf32>
    %236 = arith.mulf %235, %230 : vector<1x128xf32>
    %237 = arith.addf %234, %236 : vector<1x128xf32>
    %238 = arith.addf %229, %230 : vector<1x128xf32>
    %239 = arith.minimumf %237, %238 : vector<1x128xf32>
    %240 = arith.subf %239, %231 : vector<1x128xf32>
    %c1_i32_112 = arith.constant 1 : i32
    %241 = tpu.dynamic_rotate %240 by %c1_i32_112 dim 1 : vector<1x128xf32>, i32 -> vector<1x128xf32>
    %cst_113 = arith.constant 1.000000e+30 : f32
    %242 = vector.broadcast %cst_113 : f32 to vector<1x128xf32>
    %243 = arith.select %4, %242, %241 : vector<1x128xi1>, vector<1x128xf32>
    %244 = arith.minimumf %240, %243 : vector<1x128xf32>
    %c2_i32_114 = arith.constant 2 : i32
    %245 = tpu.dynamic_rotate %244 by %c2_i32_114 dim 1 : vector<1x128xf32>, i32 -> vector<1x128xf32>
    %cst_115 = arith.constant 1.000000e+30 : f32
    %246 = vector.broadcast %cst_115 : f32 to vector<1x128xf32>
    %247 = arith.select %6, %246, %245 : vector<1x128xi1>, vector<1x128xf32>
    %248 = arith.minimumf %244, %247 : vector<1x128xf32>
    %c4_i32_116 = arith.constant 4 : i32
    %249 = tpu.dynamic_rotate %248 by %c4_i32_116 dim 1 : vector<1x128xf32>, i32 -> vector<1x128xf32>
    %cst_117 = arith.constant 1.000000e+30 : f32
    %250 = vector.broadcast %cst_117 : f32 to vector<1x128xf32>
    %251 = arith.select %8, %250, %249 : vector<1x128xi1>, vector<1x128xf32>
    %252 = arith.minimumf %248, %251 : vector<1x128xf32>
    %c8_i32_118 = arith.constant 8 : i32
    %253 = tpu.dynamic_rotate %252 by %c8_i32_118 dim 1 : vector<1x128xf32>, i32 -> vector<1x128xf32>
    %cst_119 = arith.constant 1.000000e+30 : f32
    %254 = vector.broadcast %cst_119 : f32 to vector<1x128xf32>
    %255 = arith.select %10, %254, %253 : vector<1x128xi1>, vector<1x128xf32>
    %256 = arith.minimumf %252, %255 : vector<1x128xf32>
    %257 = arith.addf %231, %256 : vector<1x128xf32>
    %c8 = arith.constant 8 : index
    %c0_120 = arith.constant 0 : index
    %258 = vector.load %arg3[%c8, %c0_120] : memref<16x128xf32, #tpu.memory_space<vmem>>, vector<1x128xf32>
    %c8_121 = arith.constant 8 : index
    %c0_122 = arith.constant 0 : index
    %259 = vector.load %arg4[%c8_121, %c0_122] : memref<16x128xf32, #tpu.memory_space<vmem>>, vector<1x128xf32>
    %c1_i32_123 = arith.constant 1 : i32
    %260 = tpu.dynamic_rotate %257 by %c1_i32_123 dim 1 : vector<1x128xf32>, i32 -> vector<1x128xf32>
    %cst_124 = arith.constant 1.000000e+30 : f32
    %261 = vector.broadcast %cst_124 : f32 to vector<1x128xf32>
    %262 = arith.select %12, %261, %260 : vector<1x128xi1>, vector<1x128xf32>
    %cst_125 = arith.constant 2.000000e+00 : f32
    %263 = vector.broadcast %cst_125 : f32 to vector<1x128xf32>
    %264 = arith.mulf %263, %258 : vector<1x128xf32>
    %265 = arith.addf %262, %264 : vector<1x128xf32>
    %266 = arith.addf %257, %258 : vector<1x128xf32>
    %267 = arith.minimumf %265, %266 : vector<1x128xf32>
    %268 = arith.subf %267, %259 : vector<1x128xf32>
    %c1_i32_126 = arith.constant 1 : i32
    %269 = tpu.dynamic_rotate %268 by %c1_i32_126 dim 1 : vector<1x128xf32>, i32 -> vector<1x128xf32>
    %cst_127 = arith.constant 1.000000e+30 : f32
    %270 = vector.broadcast %cst_127 : f32 to vector<1x128xf32>
    %271 = arith.select %4, %270, %269 : vector<1x128xi1>, vector<1x128xf32>
    %272 = arith.minimumf %268, %271 : vector<1x128xf32>
    %c2_i32_128 = arith.constant 2 : i32
    %273 = tpu.dynamic_rotate %272 by %c2_i32_128 dim 1 : vector<1x128xf32>, i32 -> vector<1x128xf32>
    %cst_129 = arith.constant 1.000000e+30 : f32
    %274 = vector.broadcast %cst_129 : f32 to vector<1x128xf32>
    %275 = arith.select %6, %274, %273 : vector<1x128xi1>, vector<1x128xf32>
    %276 = arith.minimumf %272, %275 : vector<1x128xf32>
    %c4_i32_130 = arith.constant 4 : i32
    %277 = tpu.dynamic_rotate %276 by %c4_i32_130 dim 1 : vector<1x128xf32>, i32 -> vector<1x128xf32>
    %cst_131 = arith.constant 1.000000e+30 : f32
    %278 = vector.broadcast %cst_131 : f32 to vector<1x128xf32>
    %279 = arith.select %8, %278, %277 : vector<1x128xi1>, vector<1x128xf32>
    %280 = arith.minimumf %276, %279 : vector<1x128xf32>
    %c8_i32_132 = arith.constant 8 : i32
    %281 = tpu.dynamic_rotate %280 by %c8_i32_132 dim 1 : vector<1x128xf32>, i32 -> vector<1x128xf32>
    %cst_133 = arith.constant 1.000000e+30 : f32
    %282 = vector.broadcast %cst_133 : f32 to vector<1x128xf32>
    %283 = arith.select %10, %282, %281 : vector<1x128xi1>, vector<1x128xf32>
    %284 = arith.minimumf %280, %283 : vector<1x128xf32>
    %285 = arith.addf %259, %284 : vector<1x128xf32>
    %c9 = arith.constant 9 : index
    %c0_134 = arith.constant 0 : index
    %286 = vector.load %arg3[%c9, %c0_134] : memref<16x128xf32, #tpu.memory_space<vmem>>, vector<1x128xf32>
    %c9_135 = arith.constant 9 : index
    %c0_136 = arith.constant 0 : index
    %287 = vector.load %arg4[%c9_135, %c0_136] : memref<16x128xf32, #tpu.memory_space<vmem>>, vector<1x128xf32>
    %c1_i32_137 = arith.constant 1 : i32
    %288 = tpu.dynamic_rotate %285 by %c1_i32_137 dim 1 : vector<1x128xf32>, i32 -> vector<1x128xf32>
    %cst_138 = arith.constant 1.000000e+30 : f32
    %289 = vector.broadcast %cst_138 : f32 to vector<1x128xf32>
    %290 = arith.select %12, %289, %288 : vector<1x128xi1>, vector<1x128xf32>
    %cst_139 = arith.constant 2.000000e+00 : f32
    %291 = vector.broadcast %cst_139 : f32 to vector<1x128xf32>
    %292 = arith.mulf %291, %286 : vector<1x128xf32>
    %293 = arith.addf %290, %292 : vector<1x128xf32>
    %294 = arith.addf %285, %286 : vector<1x128xf32>
    %295 = arith.minimumf %293, %294 : vector<1x128xf32>
    %296 = arith.subf %295, %287 : vector<1x128xf32>
    %c1_i32_140 = arith.constant 1 : i32
    %297 = tpu.dynamic_rotate %296 by %c1_i32_140 dim 1 : vector<1x128xf32>, i32 -> vector<1x128xf32>
    %cst_141 = arith.constant 1.000000e+30 : f32
    %298 = vector.broadcast %cst_141 : f32 to vector<1x128xf32>
    %299 = arith.select %4, %298, %297 : vector<1x128xi1>, vector<1x128xf32>
    %300 = arith.minimumf %296, %299 : vector<1x128xf32>
    %c2_i32_142 = arith.constant 2 : i32
    %301 = tpu.dynamic_rotate %300 by %c2_i32_142 dim 1 : vector<1x128xf32>, i32 -> vector<1x128xf32>
    %cst_143 = arith.constant 1.000000e+30 : f32
    %302 = vector.broadcast %cst_143 : f32 to vector<1x128xf32>
    %303 = arith.select %6, %302, %301 : vector<1x128xi1>, vector<1x128xf32>
    %304 = arith.minimumf %300, %303 : vector<1x128xf32>
    %c4_i32_144 = arith.constant 4 : i32
    %305 = tpu.dynamic_rotate %304 by %c4_i32_144 dim 1 : vector<1x128xf32>, i32 -> vector<1x128xf32>
    %cst_145 = arith.constant 1.000000e+30 : f32
    %306 = vector.broadcast %cst_145 : f32 to vector<1x128xf32>
    %307 = arith.select %8, %306, %305 : vector<1x128xi1>, vector<1x128xf32>
    %308 = arith.minimumf %304, %307 : vector<1x128xf32>
    %c8_i32_146 = arith.constant 8 : i32
    %309 = tpu.dynamic_rotate %308 by %c8_i32_146 dim 1 : vector<1x128xf32>, i32 -> vector<1x128xf32>
    %cst_147 = arith.constant 1.000000e+30 : f32
    %310 = vector.broadcast %cst_147 : f32 to vector<1x128xf32>
    %311 = arith.select %10, %310, %309 : vector<1x128xi1>, vector<1x128xf32>
    %312 = arith.minimumf %308, %311 : vector<1x128xf32>
    %313 = arith.addf %287, %312 : vector<1x128xf32>
    %c10 = arith.constant 10 : index
    %c0_148 = arith.constant 0 : index
    %314 = vector.load %arg3[%c10, %c0_148] : memref<16x128xf32, #tpu.memory_space<vmem>>, vector<1x128xf32>
    %c10_149 = arith.constant 10 : index
    %c0_150 = arith.constant 0 : index
    %315 = vector.load %arg4[%c10_149, %c0_150] : memref<16x128xf32, #tpu.memory_space<vmem>>, vector<1x128xf32>
    %c1_i32_151 = arith.constant 1 : i32
    %316 = tpu.dynamic_rotate %313 by %c1_i32_151 dim 1 : vector<1x128xf32>, i32 -> vector<1x128xf32>
    %cst_152 = arith.constant 1.000000e+30 : f32
    %317 = vector.broadcast %cst_152 : f32 to vector<1x128xf32>
    %318 = arith.select %12, %317, %316 : vector<1x128xi1>, vector<1x128xf32>
    %cst_153 = arith.constant 2.000000e+00 : f32
    %319 = vector.broadcast %cst_153 : f32 to vector<1x128xf32>
    %320 = arith.mulf %319, %314 : vector<1x128xf32>
    %321 = arith.addf %318, %320 : vector<1x128xf32>
    %322 = arith.addf %313, %314 : vector<1x128xf32>
    %323 = arith.minimumf %321, %322 : vector<1x128xf32>
    %324 = arith.subf %323, %315 : vector<1x128xf32>
    %c1_i32_154 = arith.constant 1 : i32
    %325 = tpu.dynamic_rotate %324 by %c1_i32_154 dim 1 : vector<1x128xf32>, i32 -> vector<1x128xf32>
    %cst_155 = arith.constant 1.000000e+30 : f32
    %326 = vector.broadcast %cst_155 : f32 to vector<1x128xf32>
    %327 = arith.select %4, %326, %325 : vector<1x128xi1>, vector<1x128xf32>
    %328 = arith.minimumf %324, %327 : vector<1x128xf32>
    %c2_i32_156 = arith.constant 2 : i32
    %329 = tpu.dynamic_rotate %328 by %c2_i32_156 dim 1 : vector<1x128xf32>, i32 -> vector<1x128xf32>
    %cst_157 = arith.constant 1.000000e+30 : f32
    %330 = vector.broadcast %cst_157 : f32 to vector<1x128xf32>
    %331 = arith.select %6, %330, %329 : vector<1x128xi1>, vector<1x128xf32>
    %332 = arith.minimumf %328, %331 : vector<1x128xf32>
    %c4_i32_158 = arith.constant 4 : i32
    %333 = tpu.dynamic_rotate %332 by %c4_i32_158 dim 1 : vector<1x128xf32>, i32 -> vector<1x128xf32>
    %cst_159 = arith.constant 1.000000e+30 : f32
    %334 = vector.broadcast %cst_159 : f32 to vector<1x128xf32>
    %335 = arith.select %8, %334, %333 : vector<1x128xi1>, vector<1x128xf32>
    %336 = arith.minimumf %332, %335 : vector<1x128xf32>
    %c8_i32_160 = arith.constant 8 : i32
    %337 = tpu.dynamic_rotate %336 by %c8_i32_160 dim 1 : vector<1x128xf32>, i32 -> vector<1x128xf32>
    %cst_161 = arith.constant 1.000000e+30 : f32
    %338 = vector.broadcast %cst_161 : f32 to vector<1x128xf32>
    %339 = arith.select %10, %338, %337 : vector<1x128xi1>, vector<1x128xf32>
    %340 = arith.minimumf %336, %339 : vector<1x128xf32>
    %341 = arith.addf %315, %340 : vector<1x128xf32>
    %c11 = arith.constant 11 : index
    %c0_162 = arith.constant 0 : index
    %342 = vector.load %arg3[%c11, %c0_162] : memref<16x128xf32, #tpu.memory_space<vmem>>, vector<1x128xf32>
    %c11_163 = arith.constant 11 : index
    %c0_164 = arith.constant 0 : index
    %343 = vector.load %arg4[%c11_163, %c0_164] : memref<16x128xf32, #tpu.memory_space<vmem>>, vector<1x128xf32>
    %c1_i32_165 = arith.constant 1 : i32
    %344 = tpu.dynamic_rotate %341 by %c1_i32_165 dim 1 : vector<1x128xf32>, i32 -> vector<1x128xf32>
    %cst_166 = arith.constant 1.000000e+30 : f32
    %345 = vector.broadcast %cst_166 : f32 to vector<1x128xf32>
    %346 = arith.select %12, %345, %344 : vector<1x128xi1>, vector<1x128xf32>
    %cst_167 = arith.constant 2.000000e+00 : f32
    %347 = vector.broadcast %cst_167 : f32 to vector<1x128xf32>
    %348 = arith.mulf %347, %342 : vector<1x128xf32>
    %349 = arith.addf %346, %348 : vector<1x128xf32>
    %350 = arith.addf %341, %342 : vector<1x128xf32>
    %351 = arith.minimumf %349, %350 : vector<1x128xf32>
    %352 = arith.subf %351, %343 : vector<1x128xf32>
    %c1_i32_168 = arith.constant 1 : i32
    %353 = tpu.dynamic_rotate %352 by %c1_i32_168 dim 1 : vector<1x128xf32>, i32 -> vector<1x128xf32>
    %cst_169 = arith.constant 1.000000e+30 : f32
    %354 = vector.broadcast %cst_169 : f32 to vector<1x128xf32>
    %355 = arith.select %4, %354, %353 : vector<1x128xi1>, vector<1x128xf32>
    %356 = arith.minimumf %352, %355 : vector<1x128xf32>
    %c2_i32_170 = arith.constant 2 : i32
    %357 = tpu.dynamic_rotate %356 by %c2_i32_170 dim 1 : vector<1x128xf32>, i32 -> vector<1x128xf32>
    %cst_171 = arith.constant 1.000000e+30 : f32
    %358 = vector.broadcast %cst_171 : f32 to vector<1x128xf32>
    %359 = arith.select %6, %358, %357 : vector<1x128xi1>, vector<1x128xf32>
    %360 = arith.minimumf %356, %359 : vector<1x128xf32>
    %c4_i32_172 = arith.constant 4 : i32
    %361 = tpu.dynamic_rotate %360 by %c4_i32_172 dim 1 : vector<1x128xf32>, i32 -> vector<1x128xf32>
    %cst_173 = arith.constant 1.000000e+30 : f32
    %362 = vector.broadcast %cst_173 : f32 to vector<1x128xf32>
    %363 = arith.select %8, %362, %361 : vector<1x128xi1>, vector<1x128xf32>
    %364 = arith.minimumf %360, %363 : vector<1x128xf32>
    %c8_i32_174 = arith.constant 8 : i32
    %365 = tpu.dynamic_rotate %364 by %c8_i32_174 dim 1 : vector<1x128xf32>, i32 -> vector<1x128xf32>
    %cst_175 = arith.constant 1.000000e+30 : f32
    %366 = vector.broadcast %cst_175 : f32 to vector<1x128xf32>
    %367 = arith.select %10, %366, %365 : vector<1x128xi1>, vector<1x128xf32>
    %368 = arith.minimumf %364, %367 : vector<1x128xf32>
    %369 = arith.addf %343, %368 : vector<1x128xf32>
    %c12 = arith.constant 12 : index
    %c0_176 = arith.constant 0 : index
    %370 = vector.load %arg3[%c12, %c0_176] : memref<16x128xf32, #tpu.memory_space<vmem>>, vector<1x128xf32>
    %c12_177 = arith.constant 12 : index
    %c0_178 = arith.constant 0 : index
    %371 = vector.load %arg4[%c12_177, %c0_178] : memref<16x128xf32, #tpu.memory_space<vmem>>, vector<1x128xf32>
    %c1_i32_179 = arith.constant 1 : i32
    %372 = tpu.dynamic_rotate %369 by %c1_i32_179 dim 1 : vector<1x128xf32>, i32 -> vector<1x128xf32>
    %cst_180 = arith.constant 1.000000e+30 : f32
    %373 = vector.broadcast %cst_180 : f32 to vector<1x128xf32>
    %374 = arith.select %12, %373, %372 : vector<1x128xi1>, vector<1x128xf32>
    %cst_181 = arith.constant 2.000000e+00 : f32
    %375 = vector.broadcast %cst_181 : f32 to vector<1x128xf32>
    %376 = arith.mulf %375, %370 : vector<1x128xf32>
    %377 = arith.addf %374, %376 : vector<1x128xf32>
    %378 = arith.addf %369, %370 : vector<1x128xf32>
    %379 = arith.minimumf %377, %378 : vector<1x128xf32>
    %380 = arith.subf %379, %371 : vector<1x128xf32>
    %c1_i32_182 = arith.constant 1 : i32
    %381 = tpu.dynamic_rotate %380 by %c1_i32_182 dim 1 : vector<1x128xf32>, i32 -> vector<1x128xf32>
    %cst_183 = arith.constant 1.000000e+30 : f32
    %382 = vector.broadcast %cst_183 : f32 to vector<1x128xf32>
    %383 = arith.select %4, %382, %381 : vector<1x128xi1>, vector<1x128xf32>
    %384 = arith.minimumf %380, %383 : vector<1x128xf32>
    %c2_i32_184 = arith.constant 2 : i32
    %385 = tpu.dynamic_rotate %384 by %c2_i32_184 dim 1 : vector<1x128xf32>, i32 -> vector<1x128xf32>
    %cst_185 = arith.constant 1.000000e+30 : f32
    %386 = vector.broadcast %cst_185 : f32 to vector<1x128xf32>
    %387 = arith.select %6, %386, %385 : vector<1x128xi1>, vector<1x128xf32>
    %388 = arith.minimumf %384, %387 : vector<1x128xf32>
    %c4_i32_186 = arith.constant 4 : i32
    %389 = tpu.dynamic_rotate %388 by %c4_i32_186 dim 1 : vector<1x128xf32>, i32 -> vector<1x128xf32>
    %cst_187 = arith.constant 1.000000e+30 : f32
    %390 = vector.broadcast %cst_187 : f32 to vector<1x128xf32>
    %391 = arith.select %8, %390, %389 : vector<1x128xi1>, vector<1x128xf32>
    %392 = arith.minimumf %388, %391 : vector<1x128xf32>
    %c8_i32_188 = arith.constant 8 : i32
    %393 = tpu.dynamic_rotate %392 by %c8_i32_188 dim 1 : vector<1x128xf32>, i32 -> vector<1x128xf32>
    %cst_189 = arith.constant 1.000000e+30 : f32
    %394 = vector.broadcast %cst_189 : f32 to vector<1x128xf32>
    %395 = arith.select %10, %394, %393 : vector<1x128xi1>, vector<1x128xf32>
    %396 = arith.minimumf %392, %395 : vector<1x128xf32>
    %397 = arith.addf %371, %396 : vector<1x128xf32>
    %c13 = arith.constant 13 : index
    %c0_190 = arith.constant 0 : index
    %398 = vector.load %arg3[%c13, %c0_190] : memref<16x128xf32, #tpu.memory_space<vmem>>, vector<1x128xf32>
    %c13_191 = arith.constant 13 : index
    %c0_192 = arith.constant 0 : index
    %399 = vector.load %arg4[%c13_191, %c0_192] : memref<16x128xf32, #tpu.memory_space<vmem>>, vector<1x128xf32>
    %c1_i32_193 = arith.constant 1 : i32
    %400 = tpu.dynamic_rotate %397 by %c1_i32_193 dim 1 : vector<1x128xf32>, i32 -> vector<1x128xf32>
    %cst_194 = arith.constant 1.000000e+30 : f32
    %401 = vector.broadcast %cst_194 : f32 to vector<1x128xf32>
    %402 = arith.select %12, %401, %400 : vector<1x128xi1>, vector<1x128xf32>
    %cst_195 = arith.constant 2.000000e+00 : f32
    %403 = vector.broadcast %cst_195 : f32 to vector<1x128xf32>
    %404 = arith.mulf %403, %398 : vector<1x128xf32>
    %405 = arith.addf %402, %404 : vector<1x128xf32>
    %406 = arith.addf %397, %398 : vector<1x128xf32>
    %407 = arith.minimumf %405, %406 : vector<1x128xf32>
    %408 = arith.subf %407, %399 : vector<1x128xf32>
    %c1_i32_196 = arith.constant 1 : i32
    %409 = tpu.dynamic_rotate %408 by %c1_i32_196 dim 1 : vector<1x128xf32>, i32 -> vector<1x128xf32>
    %cst_197 = arith.constant 1.000000e+30 : f32
    %410 = vector.broadcast %cst_197 : f32 to vector<1x128xf32>
    %411 = arith.select %4, %410, %409 : vector<1x128xi1>, vector<1x128xf32>
    %412 = arith.minimumf %408, %411 : vector<1x128xf32>
    %c2_i32_198 = arith.constant 2 : i32
    %413 = tpu.dynamic_rotate %412 by %c2_i32_198 dim 1 : vector<1x128xf32>, i32 -> vector<1x128xf32>
    %cst_199 = arith.constant 1.000000e+30 : f32
    %414 = vector.broadcast %cst_199 : f32 to vector<1x128xf32>
    %415 = arith.select %6, %414, %413 : vector<1x128xi1>, vector<1x128xf32>
    %416 = arith.minimumf %412, %415 : vector<1x128xf32>
    %c4_i32_200 = arith.constant 4 : i32
    %417 = tpu.dynamic_rotate %416 by %c4_i32_200 dim 1 : vector<1x128xf32>, i32 -> vector<1x128xf32>
    %cst_201 = arith.constant 1.000000e+30 : f32
    %418 = vector.broadcast %cst_201 : f32 to vector<1x128xf32>
    %419 = arith.select %8, %418, %417 : vector<1x128xi1>, vector<1x128xf32>
    %420 = arith.minimumf %416, %419 : vector<1x128xf32>
    %c8_i32_202 = arith.constant 8 : i32
    %421 = tpu.dynamic_rotate %420 by %c8_i32_202 dim 1 : vector<1x128xf32>, i32 -> vector<1x128xf32>
    %cst_203 = arith.constant 1.000000e+30 : f32
    %422 = vector.broadcast %cst_203 : f32 to vector<1x128xf32>
    %423 = arith.select %10, %422, %421 : vector<1x128xi1>, vector<1x128xf32>
    %424 = arith.minimumf %420, %423 : vector<1x128xf32>
    %425 = arith.addf %399, %424 : vector<1x128xf32>
    %c14 = arith.constant 14 : index
    %c0_204 = arith.constant 0 : index
    %426 = vector.load %arg3[%c14, %c0_204] : memref<16x128xf32, #tpu.memory_space<vmem>>, vector<1x128xf32>
    %c14_205 = arith.constant 14 : index
    %c0_206 = arith.constant 0 : index
    %427 = vector.load %arg4[%c14_205, %c0_206] : memref<16x128xf32, #tpu.memory_space<vmem>>, vector<1x128xf32>
    %c1_i32_207 = arith.constant 1 : i32
    %428 = tpu.dynamic_rotate %425 by %c1_i32_207 dim 1 : vector<1x128xf32>, i32 -> vector<1x128xf32>
    %cst_208 = arith.constant 1.000000e+30 : f32
    %429 = vector.broadcast %cst_208 : f32 to vector<1x128xf32>
    %430 = arith.select %12, %429, %428 : vector<1x128xi1>, vector<1x128xf32>
    %cst_209 = arith.constant 2.000000e+00 : f32
    %431 = vector.broadcast %cst_209 : f32 to vector<1x128xf32>
    %432 = arith.mulf %431, %426 : vector<1x128xf32>
    %433 = arith.addf %430, %432 : vector<1x128xf32>
    %434 = arith.addf %425, %426 : vector<1x128xf32>
    %435 = arith.minimumf %433, %434 : vector<1x128xf32>
    %436 = arith.subf %435, %427 : vector<1x128xf32>
    %c1_i32_210 = arith.constant 1 : i32
    %437 = tpu.dynamic_rotate %436 by %c1_i32_210 dim 1 : vector<1x128xf32>, i32 -> vector<1x128xf32>
    %cst_211 = arith.constant 1.000000e+30 : f32
    %438 = vector.broadcast %cst_211 : f32 to vector<1x128xf32>
    %439 = arith.select %4, %438, %437 : vector<1x128xi1>, vector<1x128xf32>
    %440 = arith.minimumf %436, %439 : vector<1x128xf32>
    %c2_i32_212 = arith.constant 2 : i32
    %441 = tpu.dynamic_rotate %440 by %c2_i32_212 dim 1 : vector<1x128xf32>, i32 -> vector<1x128xf32>
    %cst_213 = arith.constant 1.000000e+30 : f32
    %442 = vector.broadcast %cst_213 : f32 to vector<1x128xf32>
    %443 = arith.select %6, %442, %441 : vector<1x128xi1>, vector<1x128xf32>
    %444 = arith.minimumf %440, %443 : vector<1x128xf32>
    %c4_i32_214 = arith.constant 4 : i32
    %445 = tpu.dynamic_rotate %444 by %c4_i32_214 dim 1 : vector<1x128xf32>, i32 -> vector<1x128xf32>
    %cst_215 = arith.constant 1.000000e+30 : f32
    %446 = vector.broadcast %cst_215 : f32 to vector<1x128xf32>
    %447 = arith.select %8, %446, %445 : vector<1x128xi1>, vector<1x128xf32>
    %448 = arith.minimumf %444, %447 : vector<1x128xf32>
    %c8_i32_216 = arith.constant 8 : i32
    %449 = tpu.dynamic_rotate %448 by %c8_i32_216 dim 1 : vector<1x128xf32>, i32 -> vector<1x128xf32>
    %cst_217 = arith.constant 1.000000e+30 : f32
    %450 = vector.broadcast %cst_217 : f32 to vector<1x128xf32>
    %451 = arith.select %10, %450, %449 : vector<1x128xi1>, vector<1x128xf32>
    %452 = arith.minimumf %448, %451 : vector<1x128xf32>
    %453 = arith.addf %427, %452 : vector<1x128xf32>
    %c15 = arith.constant 15 : index
    %c0_218 = arith.constant 0 : index
    %454 = vector.load %arg3[%c15, %c0_218] : memref<16x128xf32, #tpu.memory_space<vmem>>, vector<1x128xf32>
    %c15_219 = arith.constant 15 : index
    %c0_220 = arith.constant 0 : index
    %455 = vector.load %arg4[%c15_219, %c0_220] : memref<16x128xf32, #tpu.memory_space<vmem>>, vector<1x128xf32>
    %c1_i32_221 = arith.constant 1 : i32
    %456 = tpu.dynamic_rotate %453 by %c1_i32_221 dim 1 : vector<1x128xf32>, i32 -> vector<1x128xf32>
    %cst_222 = arith.constant 1.000000e+30 : f32
    %457 = vector.broadcast %cst_222 : f32 to vector<1x128xf32>
    %458 = arith.select %12, %457, %456 : vector<1x128xi1>, vector<1x128xf32>
    %cst_223 = arith.constant 2.000000e+00 : f32
    %459 = vector.broadcast %cst_223 : f32 to vector<1x128xf32>
    %460 = arith.mulf %459, %454 : vector<1x128xf32>
    %461 = arith.addf %458, %460 : vector<1x128xf32>
    %462 = arith.addf %453, %454 : vector<1x128xf32>
    %463 = arith.minimumf %461, %462 : vector<1x128xf32>
    %464 = arith.subf %463, %455 : vector<1x128xf32>
    %c1_i32_224 = arith.constant 1 : i32
    %465 = tpu.dynamic_rotate %464 by %c1_i32_224 dim 1 : vector<1x128xf32>, i32 -> vector<1x128xf32>
    %cst_225 = arith.constant 1.000000e+30 : f32
    %466 = vector.broadcast %cst_225 : f32 to vector<1x128xf32>
    %467 = arith.select %4, %466, %465 : vector<1x128xi1>, vector<1x128xf32>
    %468 = arith.minimumf %464, %467 : vector<1x128xf32>
    %c2_i32_226 = arith.constant 2 : i32
    %469 = tpu.dynamic_rotate %468 by %c2_i32_226 dim 1 : vector<1x128xf32>, i32 -> vector<1x128xf32>
    %cst_227 = arith.constant 1.000000e+30 : f32
    %470 = vector.broadcast %cst_227 : f32 to vector<1x128xf32>
    %471 = arith.select %6, %470, %469 : vector<1x128xi1>, vector<1x128xf32>
    %472 = arith.minimumf %468, %471 : vector<1x128xf32>
    %c4_i32_228 = arith.constant 4 : i32
    %473 = tpu.dynamic_rotate %472 by %c4_i32_228 dim 1 : vector<1x128xf32>, i32 -> vector<1x128xf32>
    %cst_229 = arith.constant 1.000000e+30 : f32
    %474 = vector.broadcast %cst_229 : f32 to vector<1x128xf32>
    %475 = arith.select %8, %474, %473 : vector<1x128xi1>, vector<1x128xf32>
    %476 = arith.minimumf %472, %475 : vector<1x128xf32>
    %c8_i32_230 = arith.constant 8 : i32
    %477 = tpu.dynamic_rotate %476 by %c8_i32_230 dim 1 : vector<1x128xf32>, i32 -> vector<1x128xf32>
    %cst_231 = arith.constant 1.000000e+30 : f32
    %478 = vector.broadcast %cst_231 : f32 to vector<1x128xf32>
    %479 = arith.select %10, %478, %477 : vector<1x128xi1>, vector<1x128xf32>
    %480 = arith.minimumf %476, %479 : vector<1x128xf32>
    %481 = arith.addf %455, %480 : vector<1x128xf32>
    %c0_232 = arith.constant 0 : index
    %c0_233 = arith.constant 0 : index
    %482 = vector.load %arg2[%c0_232, %c0_233] : memref<1x128xf32, #tpu.memory_space<vmem>>, vector<1x128xf32>
    tpu.vector_store %arg2[%c0_232, %c0_233], %481 {strides = array<i32>} : memref<1x128xf32, #tpu.memory_space<vmem>>, vector<1x128xf32>,
    return
  }
}

</mosaic_0001>

<bundles_post_ra>
// kernel: dtw_distance.1
= control target key start
LH: loop header
LB: loop body
LE: loop exit
PB: predicated region body
PF: predicated region fallthrough
CT: control target
= control target key end

     0   :  { %vm25_vm0 = vcmask 261120   ;;  %s1174_s21 = smov 4   ;;  %s1175_s22 = smov 8   ;;  %s1561_s1 = inlined_call_operand.vmem [shape: f32[32,128], index: 1, kind: input, shape index: {}]   ;;  %s1562_s0 = inlined_call_operand.vmem [shape: f32[16,32], index: 0, kind: input, shape index: {}]   ;;  %s1563_s2 = inlined_call_operand.vmem [shape: f32[1,128], index: 2, kind: output, shape index: {}]  }
   0x1   :  { %v1194_v0 = vld [vmem:[%s1561_s1 + $0x18] sm:$0xff]  ;;  %v1199_v1 = vld [vmem:[%s1561_s1 + $0x10] sm:$0xff]  ;;  %v1204_v2 = vld [vmem:[%s1561_s1 + $0x8] sm:$0xff] }
   0x2   :  { %v1207_v3 = vand.u32 4294901760, %v1194_v0  ;;  %v1210_v4 = vand.u32 4294901760, %v1199_v1  ;;  %v1213_v5 = vand.u32 4294901760, %v1204_v2  ;;  %v1218_v6 = vld [vmem:[%s1561_s1] sm:$0xff]  ;;  %v1226_v8 = vld [vmem:[%s1562_s0 + $0x8] sm:$0xff]  ;;  %v569_v41 = vmul.f32 %v1204_v2, %v1204_v2  ;;  %s1173_s1 = smov 2  }
   0x3   :  { %v11_v7 = vld [vmem:[%s1562_s0] sm:$0xff]  ;;  %v1229_v9 = vand.u32 4294901760, %v1218_v6  ;;  %v30_v11 = vsel %vm25_vm0, %v1226_v8, 0  ;;  %v568_v40 = vmul.f32 %v1218_v6, %v1218_v6  ;;  %v570_v42 = vmul.f32 %v1199_v1, %v1199_v1  ;;  %s1172_s0 = smov 1  }
   0x4   :  { %v27_v10 = vsel %vm25_vm0, %v11_v7, 0  ;;  %v560_v12 = vmul.f32 %v11_v7, %v11_v7  ;;  %1098 = vmatprep.subr.mxu0 %v1207_v3  ;;  %v147_v13 = vsub.f32 %v1194_v0, %v1207_v3  ;;  %v154_v15 = vsub.f32 %v1199_v1, %v1210_v4 }
   0x5   :  { %v1237_v14 = vand.u32 4294901760, %v27_v10  ;;  %v1241_v16 = vand.u32 4294901760, %v30_v11  ;;  %1099 = vmatpush3.msra.mxu0 %v1207_v3  ;;  %v161_v17 = vsub.f32 %v1204_v2, %v1213_v5  ;;  %v168_v18 = vsub.f32 %v1218_v6, %v1229_v9 }
   0x6   :  { %v562_v19 = vsel %vm25_vm0, %v560_v12, 0.0  ;;  %1100 = vmatprep.subr.mxu0 %v1210_v4  ;;  %v148_v20 = vand.u32 4294901760, %v147_v13  ;;  %v155_v22 = vand.u32 4294901760, %v154_v15  ;;  %v572_v43 = vadd.f32 %v569_v41, %v568_v40 }
   0x7   :  { %v102_v21 = vsub.f32 %v27_v10, %v1237_v14  ;;  %v112_v23 = vsub.f32 %v30_v11, %v1241_v16  ;;  %1117 = vmatprep.mubr.f32.mxu1 %v1237_v14  ;;  %1101 = vmatpush3.msra.mxu0 %v1210_v4  ;;  %v162_v24 = vand.u32 4294901760, %v161_v17  ;;  %v169_v25 = vand.u32 4294901760, %v168_v18 }
   0x8   :  { %563 = vadd.xlane.f32.xlu0 %v562_v19  ;;  %1102 = vmatprep.subr.mxu0 %v1213_v5  ;;  %v149_v26 = vsub.f32 %v147_v13, %v148_v20  ;;  %v156_v28 = vsub.f32 %v154_v15, %v155_v22  ;;  %v571_v44 = vmul.f32 %v1194_v0, %v1194_v0 }
   0x9   :  { %v103_v27 = vand.u32 4294901760, %v102_v21  ;;  %v113_v29 = vand.u32 4294901760, %v112_v23  ;;  %1103 = vmatpush3.msra.mxu0 %v1213_v5  ;;  %v163_v30 = vsub.f32 %v161_v17, %v162_v24  ;;  %v170_v31 = vsub.f32 %v168_v18, %v169_v25 }
   0xa   :  { %1104 = vmatprep.subr.mxu0 %v1229_v9  ;;  %v150_v32 = vand.u32 4294901760, %v149_v26  ;;  %v157_v34 = vand.u32 4294901760, %v156_v28  ;;  %v573_v45 = vadd.f32 %v572_v43, %v570_v42 }
   0xb   :  { %v104_v33 = vsub.f32 %v102_v21, %v103_v27  ;;  %v114_v35 = vsub.f32 %v112_v23, %v113_v29  ;;  %1105 = vmatpush3.msra.mxu0 %v1229_v9  ;;  %v164_v38 = vand.u32 4294901760, %v163_v30  ;;  %v171_v39 = vand.u32 4294901760, %v170_v31 }
   0xc   :  { %1109 = vmatprep.subr.mxu1 %v150_v32  ;;  %1120 = vmatprep.subr.mxu0 %v147_v13  ;;  %v574_v47 = vadd.f32 %v573_v45, %v571_v44 }
   0xd   :  { %v105_v36 = vand.u32 4294901760, %v104_v33  ;;  %v115_v37 = vand.u32 4294901760, %v114_v35  ;;  %1110 = vmatpush3.msra.mxu1 %v150_v32 }
   0xe   :  { %1111 = vmatprep.subr.mxu1 %v157_v34  ;;  %v575_v49 = vrot.slane %v574_v47, 4 }
   0xf   :  { %1106 = vmatprep.mubr.f32.mxu0 %v105_v36  ;;  %1112 = vmatpush3.msra.mxu1 %v157_v34 }
  0x10   :  { %1107 = vmatmul.mubr.f32.vlgmr.msra.gmra.mxu0 %v115_v37  ;;  %1113 = vmatprep.subr.mxu1 %v164_v38  ;;  %v576_v53 = vadd.f32 %v575_v49, %v574_v47 }
  0x11   :  { %1121 = vmatpush3.msra.mxu0 %v147_v13  ;;  %1114 = vmatpush3.msra.mxu1 %v164_v38 }
  0x12   :  { %1122 = vmatprep.subr.mxu0 %v154_v15  ;;  %1115 = vmatprep.subr.mxu1 %v171_v39  ;;  %v577_v55 = vrot.slane %v576_v53, 2 }
  0x13   :  { %1123 = vmatpush3.msra.mxu0 %v154_v15  ;;  %1116 = vmatpush3.msra.mxu1 %v171_v39 }
  0x14   :  { %1124 = vmatprep.subr.mxu0 %v161_v17  ;;  %1118 = vmatmul.mubr.f32.vlgmr.msra.gmra.mxu1 %v1241_v16  ;;  %v578_v61 = vadd.f32 %v577_v55, %v576_v53 }
  0x15   :  { %1125 = vmatpush3.msra.mxu0 %v161_v17  ;;  %1131 = vmatprep.subr.mxu1 %v1207_v3  ;;  %v17_v17 = vlaneseq }
  0x16   :  { %1126 = vmatprep.subr.mxu0 %v168_v18  ;;  %1128 = vmatprep.mubr.f32.mxu0 %v102_v21  ;;  %v579_v2 = vrot.slane %v578_v61, 1 }
  0x17   :  { %1127 = vmatpush3.msra.mxu0 %v168_v18  ;;  %1132 = vmatpush3.msra.mxu1 %v1207_v3  ;;  %v1292_v18 = vand.u32 127, %v17_v17 }
  0x18   :  { %1129 = vmatmul.mubr.f32.vlgmr.msra.gmra.mxu0 %v112_v23  ;;  %1133 = vmatprep.subr.mxu1 %v1210_v4 }
  0x19   :  { %1142 = vmatprep.subr.mxu0 %v148_v20  ;;  %1134 = vmatpush3.msra.mxu1 %v1210_v4  ;;  %vm24_vm1 = vcmp.lt.s32.totalorder %v1292_v18, 12  ;;  %vm19_vm4 = vcmp.lt.s32.totalorder %v1292_v18, 1  ;;  %vm20_vm5 = vcmp.lt.s32.totalorder %v1292_v18, 2  ;;  %vm21_vm6 = vcmp.lt.s32.totalorder %v1292_v18, 4 }
  0x1a   :  { %1143 = vmatpush3.msra.mxu0 %v148_v20  ;;  %1135 = vmatprep.subr.mxu1 %v1213_v5  ;;  %vm22_vm7 = vcmp.lt.s32.totalorder %v1292_v18, 8  ;;  %vm23_vm8 = vcmp.eq.s32.totalorder %v1292_v18, 0 }
  0x1b   :  { %1144 = vmatprep.subr.mxu0 %v155_v22  ;;  %1136 = vmatpush3.msra.mxu1 %v1213_v5 }
  0x1c   :  { %1145 = vmatpush3.msra.mxu0 %v155_v22  ;;  %1137 = vmatprep.subr.mxu1 %v1229_v9 }
  0x1d   :  { %1146 = vmatprep.subr.mxu0 %v162_v24  ;;  %1138 = vmatpush3.msra.mxu1 %v1229_v9 }
  0x1e   :  { %1139 = vmatprep.mubr.f32.mxu1 %v103_v27  ;;  %1147 = vmatpush3.msra.mxu0 %v162_v24 }
  0x1f   :  { %1140 = vmatmul.mubr.f32.vlgmr.msra.gmra.mxu1 %v113_v29  ;;  %1148 = vmatprep.subr.mxu0 %v169_v25 }
  0x20   :  { %1153 = vmatprep.subr.mxu1 %v1207_v3  ;;  %1149 = vmatpush3.msra.mxu0 %v169_v25 }
  0x21   :  { %1150 = vmatprep.mubr.f32.mxu0 %v1237_v14  ;;  %1154 = vmatpush3.msra.mxu1 %v1207_v3 }
  0x22   :  { %1151 = vmatmul.mubr.f32.vlgmr.msra.gmra.mxu0 %v1241_v16  ;;  %1155 = vmatprep.subr.mxu1 %v1210_v4 }
  0x23   :  { %1161 = vmatprep.mubr.f32.mxu1 %v1237_v14  ;;  %1156 = vmatpush3.msra.mxu1 %v1210_v4 }
  0x24   :  { %1157 = vmatprep.subr.mxu1 %v1213_v5 }
  0x25   :  { %1158 = vmatpush3.msra.mxu1 %v1213_v5  ;;  %v1287_v5 = vadd.f32 %v579_v2, %v578_v61 }
  0x26   :  { %1159 = vmatprep.subr.mxu1 %v1229_v9 }
  0x27   :  { %1160 = vmatpush3.msra.mxu1 %v1229_v9 }
  0x28   :  { %1162 = vmatmul.mubr.f32.vlgmr.msra.gmra.mxu1 %v1241_v16 }
  0x91   :  { %v564_v7 = vpop.xlane.xlu0 %563 }
  0x92   :  { %v581_v13 = vadd.f32 %v1287_v5, %v564_v7 }
  0xd0   :  { %v1108_v46 = vpop.f32.mrf.mxu0 }
  0xd2   :  { %v107_v48 = vpop.f32.mrf.mxu0 }
  0xd4   :  { %v1119_v50 = vpop.f32.mrf.mxu1 }
  0xd5   :  { %v215_v51 = vadd.f32 %v1119_v50, %v1108_v46 }
  0xd6   :  { %v208_v56 = vpop.f32.mrf.mxu1 }
  0xd7   :  { %v209_v58 = vadd.f32 %v208_v56, %v107_v48 }
  0xd8   :  { %v1130_v52 = vpop.f32.mrf.mxu0 }
  0xd9   :  { %v302_v54 = vadd.f32 %v1130_v52, %v215_v51 }
  0xda   :  { %v294_v59 = vpop.f32.mrf.mxu0 }
  0xdb   :  { %v295_v1 = vadd.f32 %v294_v59, %v209_v58 }
  0xdf   :  { %v1141_v57 = vpop.f32.mrf.mxu1 }
  0xe0   :  { %v387_v60 = vadd.f32 %v1141_v57, %v302_v54 }
  0xe1   :  { %v378_v63 = vpop.f32.mrf.mxu1 }
  0xe2   :  { %v1152_v62 = vpop.f32.mrf.mxu0  ;;  %v379_v3 = vadd.f32 %v378_v63, %v295_v1 }
  0xe3   :  { %v476_v0 = vadd.f32 %v1152_v62, %v387_v60 }
  0xe4   :  { %v469_v4 = vpop.f32.mrf.mxu0 }
  0xe5   :  { %v470_v9 = vadd.f32 %v469_v4, %v379_v3 }
  0xe8   :  { %v1163_v6 = vpop.f32.mrf.mxu1 }
  0xe9   :  { %v1289_v10 = vadd.f32 %v1163_v6, %v476_v0 }
  0xea   :  { %v550_v11 = vpop.f32.mrf.mxu1 }
  0xeb   :  { %v551_v12 = vadd.f32 %v550_v11, %v470_v9 }
  0xed   :  { %v583_v14 = vmul.f32 2.0, %v551_v12 }
  0xef   :  { %v585_v15 = vsub.f32 %v581_v13, %v583_v14 }
  0xf1   :  { %v587_v16 = vmax.f32 %v585_v15, 0.0 }
  0xf3   :  { %1168 = vrsqrt.f32 %v587_v16  ;;  %vm591_vm2 = vcmp.eq.f32.partialorder %v587_v16, inf  ;;  %v594_v21 = vand.u32 2147483648, %v587_v16  ;;  %vm593_vm3 = vcmp.eq.f32.partialorder %v587_v16, 0.0 }
 0x100   :  { %v1169_v19 = vpop.eup %1168 }
 0x101   :  { %v590_v20 = vmul.f32 %v1169_v19, %v587_v16 }
 0x103   :  { %v592_v22 = vsel %vm591_vm2, %v587_v16, %v590_v20 }
 0x104   :  { %v595_v23 = vsel %vm593_vm3, %v594_v21, %v592_v22 }
 0x105   :  { %v605_v24 = vsel %vm24_vm1, %v595_v23, 0.0 }
 0x106   :  { %609 = vrot.lane.b32.xlu0 %v605_v24, %s1172_s0  ;;  %607 = vst [vmem:[#allocation2] sm:$0xff] %v605_v24 }
 0x10d   :  { %v652_v38 = vld [vmem:[#allocation2 + $0x1] sm:$0x1]  ;;  %v679_v60 = vld [vmem:[#allocation2 + $0x2] sm:$0x1]  ;;  %v706_v22 = vld [vmem:[#allocation2 + $0x3] sm:$0x1] }
 0x10e   :  { %v657_v40 = vmul.f32 2.0, %v652_v38  ;;  %v684_v61 = vmul.f32 2.0, %v679_v60  ;;  %v711_v23 = vmul.f32 2.0, %v706_v22 }
 0x178   :  { %v610_v25 = vpop.permute.xlu0 %609 }
 0x179   :  { %v615_v26 = vsel %vm19_vm4, 0.0, %v610_v25 }
 0x17a   :  { %v617_v27 = vadd.f32 %v615_v26, %v605_v24 }
 0x17c   :  { %619 = vrot.lane.b32.xlu1 %v617_v27, %s1173_s1 }
 0x1ee   :  { %v620_v28 = vpop.permute.xlu1 %619 }
 0x1ef   :  { %v625_v29 = vsel %vm20_vm5, 0.0, %v620_v28 }
 0x1f0   :  { %v627_v30 = vadd.f32 %v625_v29, %v617_v27 }
 0x1f2   :  { %629 = vrot.lane.b32.xlu1 %v627_v30, %s1174_s21 }
 0x264   :  { %v630_v31 = vpop.permute.xlu1 %629 }
 0x265   :  { %v635_v32 = vsel %vm21_vm6, 0.0, %v630_v31 }
 0x266   :  { %v637_v33 = vadd.f32 %v635_v32, %v627_v30 }
 0x268   :  { %639 = vrot.lane.b32.xlu1 %v637_v33, %s1175_s22 }
 0x2da   :  { %v640_v34 = vpop.permute.xlu1 %639 }
 0x2db   :  { %v645_v35 = vsel %vm22_vm7, 0.0, %v640_v34 }
 0x2dc   :  { %v647_v36 = vadd.f32 %v645_v35, %v637_v33 }
 0x2de   :  { %649 = vst [vmem:[#allocation3] sm:$0xff] %v647_v36 }
 0x2e5   :  { %v651_v37 = vld [vmem:[#allocation3] sm:$0x1]  ;;  %v653_v45 = vld [vmem:[#allocation3 + $0x1] sm:$0x1]  ;;  %v680_v3 = vld [vmem:[#allocation3 + $0x2] sm:$0x1] }
 0x2e6   :  { %654 = vrot.lane.b32.xlu1 %v651_v37, %s1172_s0  ;;  %v659_v42 = vadd.f32 %v652_v38, %v651_v37  ;;  %v707_v29 = vld [vmem:[#allocation3 + $0x3] sm:$0x1] }
 0x358   :  { %v655_v39 = vpop.permute.xlu1 %654 }
 0x359   :  { %v656_v41 = vsel %vm23_vm8, 1e+30, %v655_v39 }
 0x35a   :  { %v658_v43 = vadd.f32 %v657_v40, %v656_v41 }
 0x35c   :  { %v660_v44 = vmin.f32 %v658_v43, %v659_v42 }
 0x35e   :  { %v661_v46 = vsub.f32 %v660_v44, %v653_v45  ;;  %v733_v44 = vld [vmem:[#allocation2 + $0x4] sm:$0x1] }
 0x360   :  { %662 = vrot.lane.b32.xlu1 %v661_v46, %s1172_s0 }
 0x3d2   :  { %v663_v47 = vpop.permute.xlu1 %662 }
 0x3d3   :  { %v664_v48 = vsel %vm19_vm4, 1e+30, %v663_v47 }
 0x3d4   :  { %v665_v49 = vmin.f32 %v661_v46, %v664_v48 }
 0x3d6   :  { %666 = vrot.lane.b32.xlu1 %v665_v49, %s1173_s1 }
 0x448   :  { %v667_v50 = vpop.permute.xlu1 %666 }
 0x449   :  { %v668_v51 = vsel %vm20_vm5, 1e+30, %v667_v50 }
 0x44a   :  { %v669_v52 = vmin.f32 %v665_v49, %v668_v51  ;;  %v734_v51 = vld [vmem:[#allocation3 + $0x4] sm:$0x1] }
 0x44c   :  { %670 = vrot.lane.b32.xlu1 %v669_v52, %s1174_s21 }
 0x4be   :  { %v671_v53 = vpop.permute.xlu1 %670 }
 0x4bf   :  { %v672_v54 = vsel %vm21_vm6, 1e+30, %v671_v53 }
 0x4c0   :  { %v673_v55 = vmin.f32 %v669_v52, %v672_v54 }
 0x4c2   :  { %674 = vrot.lane.b32.xlu0 %v673_v55, %s1175_s22 }
 0x534   :  { %v675_v56 = vpop.permute.xlu0 %674 }
 0x535   :  { %v676_v57 = vsel %vm22_vm7, 1e+30, %v675_v56 }
 0x536   :  { %v677_v58 = vmin.f32 %v673_v55, %v676_v57 }
 0x538   :  { %v678_v59 = vadd.f32 %v677_v58, %v653_v45  ;;  %v738_v45 = vmul.f32 2.0, %v733_v44 }
 0x53a   :  { %681 = vrot.lane.b32.xlu1 %v678_v59, %s1172_s0  ;;  %v686_v1 = vadd.f32 %v679_v60, %v678_v59 }
 0x5ac   :  { %v682_v62 = vpop.permute.xlu1 %681 }
 0x5ad   :  { %v683_v63 = vsel %vm23_vm8, 1e+30, %v682_v62 }
 0x5ae   :  { %v685_v0 = vadd.f32 %v684_v61, %v683_v63 }
 0x5b0   :  { %v687_v2 = vmin.f32 %v685_v0, %v686_v1 }
 0x5b2   :  { %v688_v4 = vsub.f32 %v687_v2, %v680_v3  ;;  %v760_v2 = vld [vmem:[#allocation2 + $0x5] sm:$0x1] }
 0x5b4   :  { %689 = vrot.lane.b32.xlu0 %v688_v4, %s1172_s0 }
 0x626   :  { %v690_v6 = vpop.permute.xlu0 %689 }
 0x627   :  { %v691_v7 = vsel %vm19_vm4, 1e+30, %v690_v6 }
 0x628   :  { %v692_v9 = vmin.f32 %v688_v4, %v691_v7 }
 0x62a   :  { %693 = vrot.lane.b32.xlu1 %v692_v9, %s1173_s1 }
 0x69c   :  { %v694_v11 = vpop.permute.xlu1 %693 }
 0x69d   :  { %v695_v12 = vsel %vm20_vm5, 1e+30, %v694_v11 }
 0x69e   :  { %v696_v13 = vmin.f32 %v692_v9, %v695_v12  ;;  %v761_v12 = vld [vmem:[#allocation3 + $0x5] sm:$0x1] }
 0x6a0   :  { %697 = vrot.lane.b32.xlu0 %v696_v13, %s1174_s21 }
 0x712   :  { %v698_v14 = vpop.permute.xlu0 %697 }
 0x713   :  { %v699_v15 = vsel %vm21_vm6, 1e+30, %v698_v14 }
 0x714   :  { %v700_v16 = vmin.f32 %v696_v13, %v699_v15 }
 0x716   :  { %701 = vrot.lane.b32.xlu1 %v700_v16, %s1175_s22 }
 0x788   :  { %v702_v17 = vpop.permute.xlu1 %701 }
 0x789   :  { %v703_v19 = vsel %vm22_vm7, 1e+30, %v702_v17 }
 0x78a   :  { %v704_v20 = vmin.f32 %v700_v16, %v703_v19 }
 0x78c   :  { %v705_v21 = vadd.f32 %v704_v20, %v680_v3  ;;  %v765_v3 = vmul.f32 2.0, %v760_v2 }
 0x78e   :  { %708 = vrot.lane.b32.xlu0 %v705_v21, %s1172_s0  ;;  %v713_v27 = vadd.f32 %v706_v22, %v705_v21 }
 0x800   :  { %v709_v24 = vpop.permute.xlu0 %708 }
 0x801   :  { %v710_v25 = vsel %vm23_vm8, 1e+30, %v709_v24 }
 0x802   :  { %v712_v26 = vadd.f32 %v711_v23, %v710_v25 }
 0x804   :  { %v714_v28 = vmin.f32 %v712_v26, %v713_v27 }
 0x806   :  { %v715_v30 = vsub.f32 %v714_v28, %v707_v29  ;;  %v787_v28 = vld [vmem:[#allocation2 + $0x6] sm:$0x1] }
 0x808   :  { %716 = vrot.lane.b32.xlu1 %v715_v30, %s1172_s0 }
 0x87a   :  { %v717_v31 = vpop.permute.xlu1 %716 }
 0x87b   :  { %v718_v32 = vsel %vm19_vm4, 1e+30, %v717_v31 }
 0x87c   :  { %v719_v33 = vmin.f32 %v715_v30, %v718_v32 }
 0x87e   :  { %720 = vrot.lane.b32.xlu0 %v719_v33, %s1173_s1 }
 0x8f0   :  { %v721_v34 = vpop.permute.xlu0 %720 }
 0x8f1   :  { %v722_v35 = vsel %vm20_vm5, 1e+30, %v721_v34 }
 0x8f2   :  { %v723_v36 = vmin.f32 %v719_v33, %v722_v35  ;;  %v788_v35 = vld [vmem:[#allocation3 + $0x6] sm:$0x1] }
 0x8f4   :  { %724 = vrot.lane.b32.xlu1 %v723_v36, %s1174_s21 }
 0x966   :  { %v725_v37 = vpop.permute.xlu1 %724 }
 0x967   :  { %v726_v38 = vsel %vm21_vm6, 1e+30, %v725_v37 }
 0x968   :  { %v727_v39 = vmin.f32 %v723_v36, %v726_v38 }
 0x96a   :  { %728 = vrot.lane.b32.xlu0 %v727_v39, %s1175_s22 }
 0x9dc   :  { %v729_v40 = vpop.permute.xlu0 %728 }
 0x9dd   :  { %v730_v41 = vsel %vm22_vm7, 1e+30, %v729_v40 }
 0x9de   :  { %v731_v42 = vmin.f32 %v727_v39, %v730_v41 }
 0x9e0   :  { %v732_v43 = vadd.f32 %v731_v42, %v707_v29  ;;  %v792_v29 = vmul.f32 2.0, %v787_v28 }
 0x9e2   :  { %735 = vrot.lane.b32.xlu1 %v732_v43, %s1172_s0  ;;  %v740_v49 = vadd.f32 %v733_v44, %v732_v43 }
 0xa54   :  { %v736_v46 = vpop.permute.xlu1 %735 }
 0xa55   :  { %v737_v47 = vsel %vm23_vm8, 1e+30, %v736_v46  ;;  %v561_v46 = vmul.f32 %v1226_v8, %v1226_v8 }
 0xa56   :  { %v739_v48 = vadd.f32 %v738_v45, %v737_v47 }
 0xa57   :  { %v565_v47 = vsel %vm25_vm0, %v561_v46, 0.0 }
 0xa58   :  { %v741_v50 = vmin.f32 %v739_v48, %v740_v49 }
 0xa5a   :  { %v742_v52 = vsub.f32 %v741_v50, %v734_v51 }
 0xa5c   :  { %743 = vrot.lane.b32.xlu0 %v742_v52, %s1172_s0 }
 0xace   :  { %v744_v53 = vpop.permute.xlu0 %743 }
 0xacf   :  { %v745_v54 = vsel %vm19_vm4, 1e+30, %v744_v53  ;;  %v584_v53 = vmul.f32 2.0, %v1289_v10 }
 0xad0   :  { %v746_v55 = vmin.f32 %v742_v52, %v745_v54 }
 0xad2   :  { %747 = vrot.lane.b32.xlu1 %v746_v55, %s1173_s1 }
 0xb44   :  { %v748_v56 = vpop.permute.xlu1 %747 }
 0xb45   :  { %v749_v57 = vsel %vm20_vm5, 1e+30, %v748_v56 }
 0xb46   :  { %v750_v58 = vmin.f32 %v746_v55, %v749_v57 }
 0xb48   :  { %751 = vrot.lane.b32.xlu0 %v750_v58, %s1174_s21 }
 0xbba   :  { %v752_v59 = vpop.permute.xlu0 %751 }
 0xbbb   :  { %v753_v60 = vsel %vm21_vm6, 1e+30, %v752_v59 }
 0xbbc   :  { %v754_v61 = vmin.f32 %v750_v58, %v753_v60 }
 0xbbe   :  { %755 = vrot.lane.b32.xlu1 %v754_v61, %s1175_s22 }
 0xc30   :  { %v756_v62 = vpop.permute.xlu1 %755 }
 0xc31   :  { %v757_v63 = vsel %vm22_vm7, 1e+30, %v756_v62  ;;  %v814_v62 = vld [vmem:[#allocation2 + $0x7] sm:$0x1] }
 0xc32   :  { %v758_v0 = vmin.f32 %v754_v61, %v757_v63  ;;  %v819_v63 = vmul.f32 2.0, %v814_v62 }
 0xc34   :  { %v759_v1 = vadd.f32 %v758_v0, %v734_v51 }
 0xc36   :  { %762 = vrot.lane.b32.xlu0 %v759_v1, %s1172_s0  ;;  %v767_v9 = vadd.f32 %v760_v2, %v759_v1 }
 0xca8   :  { %v763_v4 = vpop.permute.xlu0 %762 }
 0xca9   :  { %v764_v6 = vsel %vm23_vm8, 1e+30, %v763_v4 }
 0xcaa   :  { %v766_v7 = vadd.f32 %v765_v3, %v764_v6  ;;  %v815_v3 = vld [vmem:[#allocation3 + $0x7] sm:$0x1] }
 0xcac   :  { %v768_v11 = vmin.f32 %v766_v7, %v767_v9 }
 0xcae   :  { %v769_v13 = vsub.f32 %v768_v11, %v761_v12 }
 0xcb0   :  { %770 = vrot.lane.b32.xlu1 %v769_v13, %s1172_s0 }
 0xd22   :  { %v771_v14 = vpop.permute.xlu1 %770 }
 0xd23   :  { %v772_v15 = vsel %vm19_vm4, 1e+30, %v771_v14 }
 0xd24   :  { %v773_v16 = vmin.f32 %v769_v13, %v772_v15 }
 0xd26   :  { %774 = vrot.lane.b32.xlu0 %v773_v16, %s1173_s1 }
 0xd98   :  { %v775_v17 = vpop.permute.xlu0 %774 }
 0xd99   :  { %v776_v19 = vsel %vm20_vm5, 1e+30, %v775_v17 }
 0xd9a   :  { %v777_v20 = vmin.f32 %v773_v16, %v776_v19 }
 0xd9c   :  { %778 = vrot.lane.b32.xlu1 %v777_v20, %s1174_s21 }
 0xe0e   :  { %v779_v21 = vpop.permute.xlu1 %778 }
 0xe0f   :  { %v780_v22 = vsel %vm21_vm6, 1e+30, %v779_v21 }
 0xe10   :  { %v781_v23 = vmin.f32 %v777_v20, %v780_v22 }
 0xe12   :  { %782 = vrot.lane.b32.xlu0 %v781_v23, %s1175_s22 }
 0xe84   :  { %v783_v24 = vpop.permute.xlu0 %782 }
 0xe85   :  { %v784_v25 = vsel %vm22_vm7, 1e+30, %v783_v24 }
 0xe86   :  { %v785_v26 = vmin.f32 %v781_v23, %v784_v25 }
 0xe88   :  { %v786_v27 = vadd.f32 %v785_v26, %v761_v12 }
 0xe8a   :  { %789 = vrot.lane.b32.xlu1 %v786_v27, %s1172_s0  ;;  %v794_v33 = vadd.f32 %v787_v28, %v786_v27 }
 0xefc   :  { %v790_v30 = vpop.permute.xlu1 %789 }
 0xefd   :  { %v791_v31 = vsel %vm23_vm8, 1e+30, %v790_v30 }
 0xefe   :  { %v793_v32 = vadd.f32 %v792_v29, %v791_v31 }
 0xf00   :  { %v795_v34 = vmin.f32 %v793_v32, %v794_v33 }
 0xf02   :  { %v796_v36 = vsub.f32 %v795_v34, %v788_v35 }
 0xf04   :  { %797 = vrot.lane.b32.xlu0 %v796_v36, %s1172_s0 }
 0xf76   :  { %v798_v37 = vpop.permute.xlu0 %797 }
 0xf77   :  { %v799_v38 = vsel %vm19_vm4, 1e+30, %v798_v37 }
 0xf78   :  { %v800_v39 = vmin.f32 %v796_v36, %v799_v38 }
 0xf7a   :  { %801 = vrot.lane.b32.xlu1 %v800_v39, %s1173_s1 }
 0xfec   :  { %v802_v40 = vpop.permute.xlu1 %801 }
 0xfed   :  { %v803_v41 = vsel %vm20_vm5, 1e+30, %v802_v40 }
 0xfee   :  { %v804_v42 = vmin.f32 %v800_v39, %v803_v41 }
 0xff0   :  { %805 = vrot.lane.b32.xlu0 %v804_v42, %s1174_s21 }
0x1062   :  { %v806_v43 = vpop.permute.xlu0 %805 }
0x1063   :  { %v807_v44 = vsel %vm21_vm6, 1e+30, %v806_v43 }
0x1064   :  { %v808_v45 = vmin.f32 %v804_v42, %v807_v44 }
0x1066   :  { %809 = vrot.lane.b32.xlu1 %v808_v45, %s1175_s22 }
0x108a   :  { %566 = vadd.xlane.f32.xlu1 %v565_v47 }
0x10d8   :  { %v810_v48 = vpop.permute.xlu1 %809 }
0x10d9   :  { %v811_v49 = vsel %vm22_vm7, 1e+30, %v810_v48 }
0x10da   :  { %v812_v50 = vmin.f32 %v808_v45, %v811_v49 }
0x10dc   :  { %v813_v51 = vadd.f32 %v812_v50, %v788_v35 }
0x10de   :  { %816 = vrot.lane.b32.xlu0 %v813_v51, %s1172_s0  ;;  %v821_v1 = vadd.f32 %v814_v62, %v813_v51 }
0x1113   :  { %v567_v52 = vpop.xlane.xlu1 %566 }
0x1114   :  { %v582_v54 = vadd.f32 %v1287_v5, %v567_v52 }
0x1116   :  { %v586_v55 = vsub.f32 %v582_v54, %v584_v53 }
0x1118   :  { %v588_v56 = vmax.f32 %v586_v55, 0.0 }
0x111a   :  { %1170 = vrsqrt.f32 %v588_v56  ;;  %vm598_vm9 = vcmp.eq.f32.partialorder %v588_v56, inf  ;;  %v601_v58 = vand.u32 2147483648, %v588_v56  ;;  %vm600_vm10 = vcmp.eq.f32.partialorder %v588_v56, 0.0 }
0x1127   :  { %v1171_v8 = vpop.eup %1170 }
0x1128   :  { %v597_v57 = vmul.f32 %v1171_v8, %v588_v56 }
0x112a   :  { %v599_v59 = vsel %vm598_vm9, %v588_v56, %v597_v57 }
0x112b   :  { %v602_v60 = vsel %vm600_vm10, %v601_v58, %v599_v59 }
0x112c   :  { %v606_v61 = vsel %vm24_vm1, %v602_v60, 0.0 }
0x112d   :  { %608 = vst [vmem:[#allocation2 + $0x8] sm:$0xff] %v606_v61 }
0x1134   :  { %v841_v34 = vld [vmem:[#allocation2 + $0x8] sm:$0x1]  ;;  %v868_v56 = vld [vmem:[#allocation2 + $0x9] sm:$0x1] }
0x1135   :  { %v846_v36 = vmul.f32 2.0, %v841_v34  ;;  %v873_v8 = vmul.f32 2.0, %v868_v56 }
0x1150   :  { %v817_v0 = vpop.permute.xlu0 %816 }
0x1151   :  { %v818_v5 = vsel %vm23_vm8, 1e+30, %v817_v0 }
0x1152   :  { %v820_v10 = vadd.f32 %v819_v63, %v818_v5 }
0x1154   :  { %v822_v2 = vmin.f32 %v820_v10, %v821_v1 }
0x1156   :  { %v823_v4 = vsub.f32 %v822_v2, %v815_v3 }
0x1158   :  { %824 = vrot.lane.b32.xlu0 %v823_v4, %s1172_s0 }
0x115c   :  { %611 = vrot.lane.b32.xlu0 %v606_v61, %s1172_s0 }
0x11ca   :  { %v825_v6 = vpop.permute.xlu0 %824 }
0x11cb   :  { %v826_v7 = vsel %vm19_vm4, 1e+30, %v825_v6 }
0x11cc   :  { %v827_v9 = vmin.f32 %v823_v4, %v826_v7 }
0x11ce   :  { %828 = vrot.lane.b32.xlu0 %v827_v9, %s1173_s1  ;;  %v612_v11 = vpop.permute.xlu0 %611 }
0x11cf   :  { %v616_v12 = vsel %vm19_vm4, 0.0, %v612_v11 }
0x11d0   :  { %v618_v13 = vadd.f32 %v616_v12, %v606_v61 }
0x11d2   :  { %621 = vrot.lane.b32.xlu0 %v618_v13, %s1173_s1 }
0x1240   :  { %v829_v14 = vpop.permute.xlu0 %828 }
0x1241   :  { %v830_v15 = vsel %vm20_vm5, 1e+30, %v829_v14  ;;  %v895_v14 = vld [vmem:[#allocation2 + $0xa] sm:$0x1] }
0x1242   :  { %v831_v16 = vmin.f32 %v827_v9, %v830_v15  ;;  %v900_v15 = vmul.f32 2.0, %v895_v14 }
0x1244   :  { %832 = vrot.lane.b32.xlu0 %v831_v16, %s1174_s21  ;;  %v622_v17 = vpop.permute.xlu0 %621 }
0x1245   :  { %v626_v19 = vsel %vm20_vm5, 0.0, %v622_v17 }
0x1246   :  { %v628_v20 = vadd.f32 %v626_v19, %v618_v13 }
0x1248   :  { %631 = vrot.lane.b32.xlu0 %v628_v20, %s1174_s21 }
0x12b6   :  { %v833_v21 = vpop.permute.xlu0 %832 }
0x12b7   :  { %v834_v22 = vsel %vm21_vm6, 1e+30, %v833_v21 }
0x12b8   :  { %v835_v23 = vmin.f32 %v831_v16, %v834_v22 }
0x12ba   :  { %836 = vrot.lane.b32.xlu0 %v835_v23, %s1175_s22  ;;  %v632_v24 = vpop.permute.xlu0 %631 }
0x12bb   :  { %v636_v25 = vsel %vm21_vm6, 0.0, %v632_v24 }
0x12bc   :  { %v638_v26 = vadd.f32 %v636_v25, %v628_v20 }
0x12be   :  { %641 = vrot.lane.b32.xlu0 %v638_v26, %s1175_s22 }
0x132c   :  { %v837_v27 = vpop.permute.xlu0 %836 }
0x132d   :  { %v838_v28 = vsel %vm22_vm7, 1e+30, %v837_v27 }
0x132e   :  { %v839_v29 = vmin.f32 %v835_v23, %v838_v28 }
0x1330   :  { %v840_v30 = vadd.f32 %v839_v29, %v815_v3  ;;  %v642_v31 = vpop.permute.xlu0 %641 }
0x1331   :  { %v646_v32 = vsel %vm22_vm7, 0.0, %v642_v31 }
0x1332   :  { %v648_v33 = vadd.f32 %v646_v32, %v638_v26  ;;  %843 = vrot.lane.b32.xlu0 %v840_v30, %s1172_s0  ;;  %v848_v39 = vadd.f32 %v841_v34, %v840_v30 }
0x1334   :  { %650 = vst [vmem:[#allocation3 + $0x8] sm:$0xff] %v648_v33 }
0x133b   :  { %v842_v41 = vld [vmem:[#allocation3 + $0x8] sm:$0x1]  ;;  %v869_v62 = vld [vmem:[#allocation3 + $0x9] sm:$0x1]  ;;  %v896_v22 = vld [vmem:[#allocation3 + $0xa] sm:$0x1] }
0x13a4   :  { %v844_v35 = vpop.permute.xlu0 %843 }
0x13a5   :  { %v845_v37 = vsel %vm23_vm8, 1e+30, %v844_v35 }
0x13a6   :  { %v847_v38 = vadd.f32 %v846_v36, %v845_v37  ;;  %v922_v37 = vld [vmem:[#allocation2 + $0xb] sm:$0x1] }
0x13a8   :  { %v849_v40 = vmin.f32 %v847_v38, %v848_v39  ;;  %v927_v38 = vmul.f32 2.0, %v922_v37 }
0x13aa   :  { %v850_v42 = vsub.f32 %v849_v40, %v842_v41 }
0x13ac   :  { %851 = vrot.lane.b32.xlu1 %v850_v42, %s1172_s0 }
0x141e   :  { %v852_v43 = vpop.permute.xlu1 %851 }
0x141f   :  { %v853_v44 = vsel %vm19_vm4, 1e+30, %v852_v43 }
0x1420   :  { %v854_v45 = vmin.f32 %v850_v42, %v853_v44  ;;  %v923_v44 = vld [vmem:[#allocation3 + $0xb] sm:$0x1] }
0x1422   :  { %855 = vrot.lane.b32.xlu0 %v854_v45, %s1173_s1 }
0x1494   :  { %v856_v46 = vpop.permute.xlu0 %855 }
0x1495   :  { %v857_v47 = vsel %vm20_vm5, 1e+30, %v856_v46 }
0x1496   :  { %v858_v48 = vmin.f32 %v854_v45, %v857_v47 }
0x1498   :  { %859 = vrot.lane.b32.xlu0 %v858_v48, %s1174_s21 }
0x150a   :  { %v860_v49 = vpop.permute.xlu0 %859 }
0x150b   :  { %v861_v50 = vsel %vm21_vm6, 1e+30, %v860_v49 }
0x150c   :  { %v862_v51 = vmin.f32 %v858_v48, %v861_v50 }
0x150e   :  { %863 = vrot.lane.b32.xlu0 %v862_v51, %s1175_s22 }
0x1580   :  { %v864_v52 = vpop.permute.xlu0 %863 }
0x1581   :  { %v865_v53 = vsel %vm22_vm7, 1e+30, %v864_v52 }
0x1582   :  { %v866_v54 = vmin.f32 %v862_v51, %v865_v53 }
0x1584   :  { %v867_v55 = vadd.f32 %v866_v54, %v842_v41 }
0x1586   :  { %870 = vrot.lane.b32.xlu0 %v867_v55, %s1172_s0  ;;  %v875_v60 = vadd.f32 %v868_v56, %v867_v55 }
0x15f8   :  { %v871_v57 = vpop.permute.xlu0 %870 }
0x15f9   :  { %v872_v58 = vsel %vm23_vm8, 1e+30, %v871_v57 }
0x15fa   :  { %v874_v59 = vadd.f32 %v873_v8, %v872_v58  ;;  %v949_v58 = vld [vmem:[#allocation2 + $0xc] sm:$0x1] }
0x15fc   :  { %v876_v61 = vmin.f32 %v874_v59, %v875_v60  ;;  %v954_v59 = vmul.f32 2.0, %v949_v58 }
0x15fe   :  { %v877_v63 = vsub.f32 %v876_v61, %v869_v62 }
0x1600   :  { %878 = vrot.lane.b32.xlu1 %v877_v63, %s1172_s0 }
0x1672   :  { %v879_v0 = vpop.permute.xlu1 %878 }
0x1673   :  { %v880_v5 = vsel %vm19_vm4, 1e+30, %v879_v0 }
0x1674   :  { %v881_v10 = vmin.f32 %v877_v63, %v880_v5  ;;  %v950_v5 = vld [vmem:[#allocation3 + $0xc] sm:$0x1] }
0x1676   :  { %882 = vrot.lane.b32.xlu0 %v881_v10, %s1173_s1 }
0x16e8   :  { %v883_v1 = vpop.permute.xlu0 %882 }
0x16e9   :  { %v884_v2 = vsel %vm20_vm5, 1e+30, %v883_v1 }
0x16ea   :  { %v885_v3 = vmin.f32 %v881_v10, %v884_v2 }
0x16ec   :  { %886 = vrot.lane.b32.xlu1 %v885_v3, %s1174_s21 }
0x175e   :  { %v887_v4 = vpop.permute.xlu1 %886 }
0x175f   :  { %v888_v6 = vsel %vm21_vm6, 1e+30, %v887_v4 }
0x1760   :  { %v889_v7 = vmin.f32 %v885_v3, %v888_v6 }
0x1762   :  { %890 = vrot.lane.b32.xlu0 %v889_v7, %s1175_s22 }
0x17d4   :  { %v891_v9 = vpop.permute.xlu0 %890 }
0x17d5   :  { %v892_v11 = vsel %vm22_vm7, 1e+30, %v891_v9 }
0x17d6   :  { %v893_v12 = vmin.f32 %v889_v7, %v892_v11 }
0x17d8   :  { %v894_v13 = vadd.f32 %v893_v12, %v869_v62 }
0x17da   :  { %897 = vrot.lane.b32.xlu1 %v894_v13, %s1172_s0  ;;  %v902_v20 = vadd.f32 %v895_v14, %v894_v13 }
0x184c   :  { %v898_v16 = vpop.permute.xlu1 %897 }
0x184d   :  { %v899_v17 = vsel %vm23_vm8, 1e+30, %v898_v16 }
0x184e   :  { %v901_v19 = vadd.f32 %v900_v15, %v899_v17  ;;  %v976_v17 = vld [vmem:[#allocation2 + $0xd] sm:$0x1] }
0x1850   :  { %v903_v21 = vmin.f32 %v901_v19, %v902_v20  ;;  %v981_v19 = vmul.f32 2.0, %v976_v17 }
0x1852   :  { %v904_v23 = vsub.f32 %v903_v21, %v896_v22 }
0x1854   :  { %905 = vrot.lane.b32.xlu0 %v904_v23, %s1172_s0 }
0x18c6   :  { %v906_v24 = vpop.permute.xlu0 %905 }
0x18c7   :  { %v907_v25 = vsel %vm19_vm4, 1e+30, %v906_v24 }
0x18c8   :  { %v908_v26 = vmin.f32 %v904_v23, %v907_v25  ;;  %v977_v25 = vld [vmem:[#allocation3 + $0xd] sm:$0x1] }
0x18ca   :  { %909 = vrot.lane.b32.xlu1 %v908_v26, %s1173_s1 }
0x193c   :  { %v910_v27 = vpop.permute.xlu1 %909 }
0x193d   :  { %v911_v28 = vsel %vm20_vm5, 1e+30, %v910_v27 }
0x193e   :  { %v912_v29 = vmin.f32 %v908_v26, %v911_v28 }
0x1940   :  { %913 = vrot.lane.b32.xlu0 %v912_v29, %s1174_s21 }
0x19b2   :  { %v914_v30 = vpop.permute.xlu0 %913 }
0x19b3   :  { %v915_v31 = vsel %vm21_vm6, 1e+30, %v914_v30 }
0x19b4   :  { %v916_v32 = vmin.f32 %v912_v29, %v915_v31 }
0x19b6   :  { %917 = vrot.lane.b32.xlu1 %v916_v32, %s1175_s22 }
0x1a28   :  { %v918_v33 = vpop.permute.xlu1 %917 }
0x1a29   :  { %v919_v34 = vsel %vm22_vm7, 1e+30, %v918_v33 }
0x1a2a   :  { %v920_v35 = vmin.f32 %v916_v32, %v919_v34 }
0x1a2c   :  { %v921_v36 = vadd.f32 %v920_v35, %v896_v22 }
0x1a2e   :  { %924 = vrot.lane.b32.xlu0 %v921_v36, %s1172_s0  ;;  %v929_v42 = vadd.f32 %v922_v37, %v921_v36 }
0x1aa0   :  { %v925_v39 = vpop.permute.xlu0 %924 }
0x1aa1   :  { %v926_v40 = vsel %vm23_vm8, 1e+30, %v925_v39 }
0x1aa2   :  { %v928_v41 = vadd.f32 %v927_v38, %v926_v40  ;;  %v1003_v40 = vld [vmem:[#allocation2 + $0xe] sm:$0x1] }
0x1aa4   :  { %v930_v43 = vmin.f32 %v928_v41, %v929_v42  ;;  %v1008_v41 = vmul.f32 2.0, %v1003_v40 }
0x1aa6   :  { %v931_v45 = vsub.f32 %v930_v43, %v923_v44 }
0x1aa8   :  { %932 = vrot.lane.b32.xlu1 %v931_v45, %s1172_s0 }
0x1b1a   :  { %v933_v46 = vpop.permute.xlu1 %932 }
0x1b1b   :  { %v934_v47 = vsel %vm19_vm4, 1e+30, %v933_v46 }
0x1b1c   :  { %v935_v48 = vmin.f32 %v931_v45, %v934_v47  ;;  %v1004_v47 = vld [vmem:[#allocation3 + $0xe] sm:$0x1] }
0x1b1e   :  { %936 = vrot.lane.b32.xlu0 %v935_v48, %s1173_s1 }
0x1b90   :  { %v937_v49 = vpop.permute.xlu0 %936 }
0x1b91   :  { %v938_v50 = vsel %vm20_vm5, 1e+30, %v937_v49 }
0x1b92   :  { %v939_v51 = vmin.f32 %v935_v48, %v938_v50 }
0x1b94   :  { %940 = vrot.lane.b32.xlu1 %v939_v51, %s1174_s21 }
0x1c06   :  { %v941_v52 = vpop.permute.xlu1 %940 }
0x1c07   :  { %v942_v53 = vsel %vm21_vm6, 1e+30, %v941_v52 }
0x1c08   :  { %v943_v54 = vmin.f32 %v939_v51, %v942_v53 }
0x1c0a   :  { %944 = vrot.lane.b32.xlu0 %v943_v54, %s1175_s22 }
0x1c7c   :  { %v945_v55 = vpop.permute.xlu0 %944 }
0x1c7d   :  { %v946_v56 = vsel %vm22_vm7, 1e+30, %v945_v55 }
0x1c7e   :  { %v947_v8 = vmin.f32 %v943_v54, %v946_v56 }
0x1c80   :  { %v948_v57 = vadd.f32 %v947_v8, %v923_v44 }
0x1c82   :  { %951 = vrot.lane.b32.xlu1 %v948_v57, %s1172_s0  ;;  %v956_v63 = vadd.f32 %v949_v58, %v948_v57 }
0x1cf4   :  { %v952_v60 = vpop.permute.xlu1 %951 }
0x1cf5   :  { %v953_v61 = vsel %vm23_vm8, 1e+30, %v952_v60 }
0x1cf6   :  { %v955_v62 = vadd.f32 %v954_v59, %v953_v61  ;;  %v1030_v61 = vld [vmem:[#allocation2 + $0xf] sm:$0x1] }
0x1cf8   :  { %v957_v0 = vmin.f32 %v955_v62, %v956_v63  ;;  %v1035_v62 = vmul.f32 2.0, %v1030_v61 }
0x1cfa   :  { %v958_v10 = vsub.f32 %v957_v0, %v950_v5 }
0x1cfc   :  { %959 = vrot.lane.b32.xlu0 %v958_v10, %s1172_s0 }
0x1d6e   :  { %v960_v1 = vpop.permute.xlu0 %959 }
0x1d6f   :  { %v961_v2 = vsel %vm19_vm4, 1e+30, %v960_v1 }
0x1d70   :  { %v962_v3 = vmin.f32 %v958_v10, %v961_v2  ;;  %v1031_v2 = vld [vmem:[#allocation3 + $0xf] sm:$0x1] }
0x1d72   :  { %963 = vrot.lane.b32.xlu1 %v962_v3, %s1173_s1 }
0x1de4   :  { %v964_v4 = vpop.permute.xlu1 %963 }
0x1de5   :  { %v965_v6 = vsel %vm20_vm5, 1e+30, %v964_v4 }
0x1de6   :  { %v966_v7 = vmin.f32 %v962_v3, %v965_v6 }
0x1de8   :  { %967 = vrot.lane.b32.xlu0 %v966_v7, %s1174_s21 }
0x1e5a   :  { %v968_v9 = vpop.permute.xlu0 %967 }
0x1e5b   :  { %v969_v11 = vsel %vm21_vm6, 1e+30, %v968_v9 }
0x1e5c   :  { %v970_v12 = vmin.f32 %v966_v7, %v969_v11 }
0x1e5e   :  { %971 = vrot.lane.b32.xlu1 %v970_v12, %s1175_s22 }
0x1ed0   :  { %v972_v13 = vpop.permute.xlu1 %971 }
0x1ed1   :  { %v973_v14 = vsel %vm22_vm7, 1e+30, %v972_v13 }
0x1ed2   :  { %v974_v15 = vmin.f32 %v970_v12, %v973_v14 }
0x1ed4   :  { %v975_v16 = vadd.f32 %v974_v15, %v950_v5 }
0x1ed6   :  { %978 = vrot.lane.b32.xlu0 %v975_v16, %s1172_s0  ;;  %v983_v23 = vadd.f32 %v976_v17, %v975_v16 }
0x1f48   :  { %v979_v20 = vpop.permute.xlu0 %978 }
0x1f49   :  { %v980_v21 = vsel %vm23_vm8, 1e+30, %v979_v20 }
0x1f4a   :  { %v982_v22 = vadd.f32 %v981_v19, %v980_v21 }
0x1f4c   :  { %v984_v24 = vmin.f32 %v982_v22, %v983_v23 }
0x1f4e   :  { %v985_v26 = vsub.f32 %v984_v24, %v977_v25 }
0x1f50   :  { %986 = vrot.lane.b32.xlu1 %v985_v26, %s1172_s0 }
0x1fc2   :  { %v987_v27 = vpop.permute.xlu1 %986 }
0x1fc3   :  { %v988_v28 = vsel %vm19_vm4, 1e+30, %v987_v27 }
0x1fc4   :  { %v989_v29 = vmin.f32 %v985_v26, %v988_v28 }
0x1fc6   :  { %990 = vrot.lane.b32.xlu0 %v989_v29, %s1173_s1 }
0x2038   :  { %v991_v30 = vpop.permute.xlu0 %990 }
0x2039   :  { %v992_v31 = vsel %vm20_vm5, 1e+30, %v991_v30 }
0x203a   :  { %v993_v32 = vmin.f32 %v989_v29, %v992_v31 }
0x203c   :  { %994 = vrot.lane.b32.xlu1 %v993_v32, %s1174_s21 }
0x20ae   :  { %v995_v33 = vpop.permute.xlu1 %994 }
0x20af   :  { %v996_v34 = vsel %vm21_vm6, 1e+30, %v995_v33 }
0x20b0   :  { %v997_v35 = vmin.f32 %v993_v32, %v996_v34 }
0x20b2   :  { %998 = vrot.lane.b32.xlu0 %v997_v35, %s1175_s22 }
0x2124   :  { %v999_v36 = vpop.permute.xlu0 %998 }
0x2125   :  { %v1000_v37 = vsel %vm22_vm7, 1e+30, %v999_v36 }
0x2126   :  { %v1001_v38 = vmin.f32 %v997_v35, %v1000_v37 }
0x2128   :  { %v1002_v39 = vadd.f32 %v1001_v38, %v977_v25 }
0x212a   :  { %1005 = vrot.lane.b32.xlu1 %v1002_v39, %s1172_s0  ;;  %v1010_v45 = vadd.f32 %v1003_v40, %v1002_v39 }
0x219c   :  { %v1006_v42 = vpop.permute.xlu1 %1005 }
0x219d   :  { %v1007_v43 = vsel %vm23_vm8, 1e+30, %v1006_v42 }
0x219e   :  { %v1009_v44 = vadd.f32 %v1008_v41, %v1007_v43 }
0x21a0   :  { %v1011_v46 = vmin.f32 %v1009_v44, %v1010_v45 }
0x21a2   :  { %v1012_v48 = vsub.f32 %v1011_v46, %v1004_v47 }
0x21a4   :  { %1013 = vrot.lane.b32.xlu0 %v1012_v48, %s1172_s0 }
0x2216   :  { %v1014_v49 = vpop.permute.xlu0 %1013 }
0x2217   :  { %v1015_v50 = vsel %vm19_vm4, 1e+30, %v1014_v49 }
0x2218   :  { %v1016_v51 = vmin.f32 %v1012_v48, %v1015_v50 }
0x221a   :  { %1017 = vrot.lane.b32.xlu1 %v1016_v51, %s1173_s1 }
0x228c   :  { %v1018_v52 = vpop.permute.xlu1 %1017 }
0x228d   :  { %v1019_v53 = vsel %vm20_vm5, 1e+30, %v1018_v52 }
0x228e   :  { %v1020_v54 = vmin.f32 %v1016_v51, %v1019_v53 }
0x2290   :  { %1021 = vrot.lane.b32.xlu0 %v1020_v54, %s1174_s21 }
0x2302   :  { %v1022_v55 = vpop.permute.xlu0 %1021 }
0x2303   :  { %v1023_v56 = vsel %vm21_vm6, 1e+30, %v1022_v55 }
0x2304   :  { %v1024_v8 = vmin.f32 %v1020_v54, %v1023_v56 }
0x2306   :  { %1025 = vrot.lane.b32.xlu1 %v1024_v8, %s1175_s22 }
0x2378   :  { %v1026_v57 = vpop.permute.xlu1 %1025 }
0x2379   :  { %v1027_v58 = vsel %vm22_vm7, 1e+30, %v1026_v57 }
0x237a   :  { %v1028_v59 = vmin.f32 %v1024_v8, %v1027_v58 }
0x237c   :  { %v1029_v60 = vadd.f32 %v1028_v59, %v1004_v47 }
0x237e   :  { %1032 = vrot.lane.b32.xlu0 %v1029_v60, %s1172_s0  ;;  %v1037_v10 = vadd.f32 %v1030_v61, %v1029_v60 }
0x23f0   :  { %v1033_v63 = vpop.permute.xlu0 %1032 }
0x23f1   :  { %v1034_v0 = vsel %vm23_vm8, 1e+30, %v1033_v63 }
0x23f2   :  { %v1036_v5 = vadd.f32 %v1035_v62, %v1034_v0 }
0x23f4   :  { %v1038_v1 = vmin.f32 %v1036_v5, %v1037_v10 }
0x23f6   :  { %v1039_v3 = vsub.f32 %v1038_v1, %v1031_v2 }
0x23f8   :  { %1040 = vrot.lane.b32.xlu1 %v1039_v3, %s1172_s0 }
0x246a   :  { %v1041_v4 = vpop.permute.xlu1 %1040 }
0x246b   :  { %v1042_v6 = vsel %vm19_vm4, 1e+30, %v1041_v4 }
0x246c   :  { %v1043_v7 = vmin.f32 %v1039_v3, %v1042_v6 }
0x246e   :  { %1044 = vrot.lane.b32.xlu0 %v1043_v7, %s1173_s1 }
0x24e0   :  { %v1045_v9 = vpop.permute.xlu0 %1044 }
0x24e1   :  { %v1046_v11 = vsel %vm20_vm5, 1e+30, %v1045_v9 }
0x24e2   :  { %v1047_v12 = vmin.f32 %v1043_v7, %v1046_v11 }
0x24e4   :  { %1048 = vrot.lane.b32.xlu1 %v1047_v12, %s1174_s21 }
0x2556   :  { %v1049_v13 = vpop.permute.xlu1 %1048 }
0x2557   :  { %v1050_v14 = vsel %vm21_vm6, 1e+30, %v1049_v13 }
0x2558   :  { %v1051_v15 = vmin.f32 %v1047_v12, %v1050_v14 }
0x255a   :  { %1052 = vrot.lane.b32.xlu0 %v1051_v15, %s1175_s22 }
0x25cc   :  { %v1053_v16 = vpop.permute.xlu0 %1052 }
0x25cd   :  { %v1054_v17 = vsel %vm22_vm7, 1e+30, %v1053_v16 }
0x25ce   :  { %v1055_v19 = vmin.f32 %v1051_v15, %v1054_v17 }
0x25d0   :  { %v1056_v20 = vadd.f32 %v1055_v19, %v1031_v2 }
0x25d2   :  { %1057 = vst [vmem:[%s1563_s2] sm:$0x1] %v1056_v20 }

</bundles_post_ra>
